<compile_context>
chip_gen: v6e
topology: v6e:2x2x1
jax: 0.10.0
libtpu: 0.0.40
codegen_flags: <defaults>
</compile_context>

<pallas_src>
import math
import jax
import jax.numpy as jnp
from jax.experimental import pallas as pl
from jax.experimental.pallas import tpu as pltpu

# ----------------------------- model dims ----------------------------------
B = 2          # batch
T = 8          # target sequence length
S = 8          # source (memory) sequence length
D = 32         # d_model ("size")
H = 4          # attention heads
DK = D // H    # per-head dim
DFF = 64       # feed-forward hidden dim
EPS = 1e-6
DROPOUT_P = 0.0  # eval / p=0 -> dropout is identity

# ----------------------------- fused kernel ---------------------------------

def _decoder_layer_kernel(
    # data
    x_ref, mem_ref, tgt_m_ref, src_m_ref,
    # self-attention (fused QKV)
    sa_wqkv_ref, sa_bqkv_ref, sa_wo_ref, sa_bo_ref,
    # source-attention (fused KV)
    ca_wq_ref, ca_bq_ref, ca_wkv_ref, ca_bkv_ref, ca_wo_ref, ca_bo_ref,
    # feed-forward
    ff_w1_ref, ff_b1_ref, ff_w2_ref, ff_b2_ref,
    # layer norms
    g0_ref, b0_ref, g1_ref, b1_ref, g2_ref, b2_ref,
    # output
    o_ref,
):
    x = x_ref[0].astype(jnp.float32)          # (T, D)
    mem = mem_ref[0].astype(jnp.float32)      # (S, D)
    tgt_mask = tgt_m_ref[0]                   # (T, T) int32
    src_mask = src_m_ref[0]                   # (1, S) int32

    inv_sqrt_dk = jnp.float32(1.0 / math.sqrt(DK))

    def layer_norm(v, g_ref, b_ref):
        # torch .std(-1) is unbiased (ddof=1); eps added to std (not var)
        mean = jnp.mean(v, axis=-1, keepdims=True)
        var = jnp.sum((v - mean) ** 2, axis=-1, keepdims=True) / (v.shape[-1] - 1)
        std = jnp.sqrt(var)
        return g_ref[0] * ((v - mean) / (std + EPS)) + b_ref[0]

    def mha(q_full, k_full, v_full, mask):
        # q_full: (Tq, D); k_full/v_full: (Tk, D); mask broadcastable to (Tq, Tk)
        tq, tk = q_full.shape[0], k_full.shape[0]
        keep = jnp.broadcast_to(mask != 0, (tq, tk))      # hoisted out of head loop
        head_outs = []
        for h in range(H):
            sl = slice(h * DK, (h + 1) * DK)              # static lane slice
            qh = q_full[:, sl]
            kh = k_full[:, sl]
            vh = v_full[:, sl]
            scores = jax.lax.dot_general(
                qh, kh, (((1,), (1,)), ((), ())),
                preferred_element_type=jnp.float32) * inv_sqrt_dk
            scores = jnp.where(keep, scores, jnp.float32(-1e9))
            scores = scores - jnp.max(scores, axis=-1, keepdims=True)
            p = jnp.exp(scores)
            p = p * pl.reciprocal(jnp.sum(p, axis=-1, keepdims=True), approx=True)
            head_outs.append(jnp.dot(p, vh, preferred_element_type=jnp.float32))
        return jnp.concatenate(head_outs, axis=-1)        # (Tq, D)

    # --- sublayer 0: self-attention (fused QKV projection) -------------------
    nx = layer_norm(x, g0_ref, b0_ref)
    qkv = jnp.dot(nx, sa_wqkv_ref[...],
                  preferred_element_type=jnp.float32) + sa_bqkv_ref[0]
    q, k, v = qkv[:, :D], qkv[:, D:2 * D], qkv[:, 2 * D:]
    attn = mha(q, k, v, tgt_mask)
    attn = jnp.dot(attn, sa_wo_ref[...],
                   preferred_element_type=jnp.float32) + sa_bo_ref[0]
    x = x + attn

    # --- sublayer 1: source attention (keys/values from raw memory) ----------
    nx = layer_norm(x, g1_ref, b1_ref)
    q = jnp.dot(nx, ca_wq_ref[...],
                preferred_element_type=jnp.float32) + ca_bq_ref[0]
    kv = jnp.dot(mem, ca_wkv_ref[...],
                 preferred_element_type=jnp.float32) + ca_bkv_ref[0]
    k, v = kv[:, :D], kv[:, D:]
    attn = mha(q, k, v, src_mask)
    attn = jnp.dot(attn, ca_wo_ref[...],
                   preferred_element_type=jnp.float32) + ca_bo_ref[0]
    x = x + attn

    # --- sublayer 2: feed forward --------------------------------------------
    # TODO(synk): dropout between FF layers / after sublayers is identity (p=0 / eval mode)
    nx = layer_norm(x, g2_ref, b2_ref)
    hdn = jnp.maximum(
        jnp.dot(nx, ff_w1_ref[...], preferred_element_type=jnp.float32) + ff_b1_ref[0],
        0.0)
    ffo = jnp.dot(hdn, ff_w2_ref[...],
                  preferred_element_type=jnp.float32) + ff_b2_ref[0]
    x = x + ffo

    o_ref[0] = x.astype(o_ref.dtype)


# ----------------------------- pallas_call wrapper ---------------------------

def decoder_layer(params, x, memory, src_mask, tgt_mask):
    """Fused forward of DecoderLayer (dropout treated as identity).

    x:        (B, T, D)
    memory:   (B, S, D)
    src_mask: (1 or B, 1, S) int-like, nonzero = attend
    tgt_mask: (1 or B, T, T) int-like, nonzero = attend
    """
    b, t, d = x.shape
    s = memory.shape[1]
    tgt_mask = tgt_mask.astype(jnp.int32)
    src_mask = src_mask.astype(jnp.int32)
    tgt_batched = tgt_mask.shape[0] > 1
    src_batched = src_mask.shape[0] > 1

    sa, ca, ff = params["self_attn"], params["src_attn"], params["ff"]

    weight_args = [
        sa["wqkv"], sa["bqkv"].reshape(1, 3 * d), sa["wo"], sa["bo"].reshape(1, d),
        ca["wq"], ca["bq"].reshape(1, d),
        ca["wkv"], ca["bkv"].reshape(1, 2 * d),
        ca["wo"], ca["bo"].reshape(1, d),
        ff["w1"], ff["b1"].reshape(1, -1), ff["w2"], ff["b2"].reshape(1, d),
        params["ln0_g"].reshape(1, d), params["ln0_b"].reshape(1, d),
        params["ln1_g"].reshape(1, d), params["ln1_b"].reshape(1, d),
        params["ln2_g"].reshape(1, d), params["ln2_b"].reshape(1, d),
    ]
    # Whole 2-D weight resident in VMEM; same block every grid step -> DMA'd once.
    weight_specs = [pl.BlockSpec(w.shape, lambda i: (0, 0)) for w in weight_args]

    in_specs = [
        pl.BlockSpec((1, t, d), lambda i: (i, 0, 0)),                      # x
        pl.BlockSpec((1, s, d), lambda i: (i, 0, 0)),                      # memory
        pl.BlockSpec((1, t, t),
                     (lambda i: (i, 0, 0)) if tgt_batched else (lambda i: (0, 0, 0))),
        pl.BlockSpec((1, 1, s),
                     (lambda i: (i, 0, 0)) if src_batched else (lambda i: (0, 0, 0))),
    ] + weight_specs

    return pl.pallas_call(
        _decoder_layer_kernel,
        out_shape=jax.ShapeDtypeStruct((b, t, d), x.dtype),
        grid=(b,),
        in_specs=in_specs,
        out_specs=pl.BlockSpec((1, t, d), lambda i: (i, 0, 0)),
        compiler_params=pltpu.CompilerParams(dimension_semantics=("parallel",)),
    )(x, memory, tgt_mask, src_mask, *weight_args)


# ----------------------------- parameter init --------------------------------

def init_params(key):
    def nrm(k, shape, scale=0.02):
        return (scale * jax.random.normal(k, shape)).astype(jnp.float32)

    keys = jax.random.split(key, 3)
    sa_keys = jax.random.split(keys[0], 8)
    ca_keys = jax.random.split(keys[1], 8)
    ff_keys = jax.random.split(keys[2], 4)

    self_attn = {
        # fused Q|K|V projection
        "wqkv": jnp.concatenate([nrm(sa_keys[0], (D, D)),
                                 nrm(sa_keys[2], (D, D)),
                                 nrm(sa_keys[4], (D, D))], axis=1),
        "bqkv": jnp.concatenate([nrm(sa_keys[1], (D,)),
                                 nrm(sa_keys[3], (D,)),
                                 nrm(sa_keys[5], (D,))]),
        "wo": nrm(sa_keys[6], (D, D)), "bo": nrm(sa_keys[7], (D,)),
    }
    src_attn = {
        "wq": nrm(ca_keys[0], (D, D)), "bq": nrm(ca_keys[1], (D,)),
        # fused K|V projection (applied to memory)
        "wkv": jnp.concatenate([nrm(ca_keys[2], (D, D)),
                                nrm(ca_keys[4], (D, D))], axis=1),
        "bkv": jnp.concatenate([nrm(ca_keys[3], (D,)),
                                nrm(ca_keys[5], (D,))]),
        "wo": nrm(ca_keys[6], (D, D)), "bo": nrm(ca_keys[7], (D,)),
    }
    ff = {
        "w1": nrm(ff_keys[0], (D, DFF)), "b1": nrm(ff_keys[1], (DFF,)),
        "w2": nrm(ff_keys[2], (DFF, D)), "b2": nrm(ff_keys[3], (D,)),
    }
    return {
        "self_attn": self_attn,
        "src_attn": src_attn,
        "ff": ff,
        "ln0_g": jnp.ones((D,), jnp.float32), "ln0_b": jnp.zeros((D,), jnp.float32),
        "ln1_g": jnp.ones((D,), jnp.float32), "ln1_b": jnp.zeros((D,), jnp.float32),
        "ln2_g": jnp.ones((D,), jnp.float32), "ln2_b": jnp.zeros((D,), jnp.float32),
    }


# ----------------------------- main -------------------------------------------

if __name__ == "__main__":
    root = jax.random.PRNGKey(0)
    k_param, k_x, k_mem = jax.random.split(root, 3)

    params = init_params(k_param)
    x = jax.random.normal(k_x, (B, T, D), dtype=jnp.float32)
    memory = jax.random.normal(k_mem, (B, S, D), dtype=jnp.float32)

    # masks passed un-broadcast: causal (1, T, T), all-attend padding (B, 1, S)
    tgt_mask = jnp.tril(jnp.ones((T, T), jnp.int32))[None, :, :]
    src_mask = jnp.ones((B, 1, S), jnp.int32)

    fwd = jax.jit(decoder_layer)
    out = fwd(params, x, memory, src_mask, tgt_mask)
    out = jax.block_until_ready(out)

    assert out.shape == (B, T, D)
    assert bool(jnp.all(jnp.isfinite(out)))
    print("KERNEL_OK")
</pallas_src>

<mosaic_0001>
module attributes {stable_mosaic.version = 11 : i64} {
  func.func @_decoder_layer_kernel(%arg0: i32, %arg1: memref<1x8x32xf32, #tpu.memory_space<vmem>>, %arg2: memref<1x8x32xf32, #tpu.memory_space<vmem>>, %arg3: memref<1x8x8xi32, #tpu.memory_space<vmem>>, %arg4: memref<1x1x8xi32, #tpu.memory_space<vmem>>, %arg5: memref<32x96xf32, #tpu.memory_space<vmem>>, %arg6: memref<1x96xf32, #tpu.memory_space<vmem>>, %arg7: memref<32x32xf32, #tpu.memory_space<vmem>>, %arg8: memref<1x32xf32, #tpu.memory_space<vmem>>, %arg9: memref<32x32xf32, #tpu.memory_space<vmem>>, %arg10: memref<1x32xf32, #tpu.memory_space<vmem>>, %arg11: memref<32x64xf32, #tpu.memory_space<vmem>>, %arg12: memref<1x64xf32, #tpu.memory_space<vmem>>, %arg13: memref<32x32xf32, #tpu.memory_space<vmem>>, %arg14: memref<1x32xf32, #tpu.memory_space<vmem>>, %arg15: memref<32x64xf32, #tpu.memory_space<vmem>>, %arg16: memref<1x64xf32, #tpu.memory_space<vmem>>, %arg17: memref<64x32xf32, #tpu.memory_space<vmem>>, %arg18: memref<1x32xf32, #tpu.memory_space<vmem>>, %arg19: memref<1x32xf32, #tpu.memory_space<vmem>>, %arg20: memref<1x32xf32, #tpu.memory_space<vmem>>, %arg21: memref<1x32xf32, #tpu.memory_space<vmem>>, %arg22: memref<1x32xf32, #tpu.memory_space<vmem>>, %arg23: memref<1x32xf32, #tpu.memory_space<vmem>>, %arg24: memref<1x32xf32, #tpu.memory_space<vmem>>, %arg25: memref<1x8x32xf32, #tpu.memory_space<vmem>>) attributes {dimension_semantics = [#tpu.dimension_semantics<parallel>], iteration_bounds = array<i64: 2>, scalar_prefetch = 0 : i64, scratch_operands = 0 : i64, tpu.core_type = #tpu.core_type<tc>, window_params = [{transform_indices = @transform_0, window_bounds = array<i64: 1, 8, 32>}, {transform_indices = @transform_1, window_bounds = array<i64: 1, 8, 32>}, {pipeline_mode = #tpu.pipeline_mode<synchronous>, transform_indices = @transform_2, window_bounds = array<i64: 1, 8, 8>}, {transform_indices = @transform_3, window_bounds = array<i64: 1, 1, 8>}, {pipeline_mode = #tpu.pipeline_mode<synchronous>, transform_indices = @transform_4, window_bounds = array<i64: 32, 96>}, {pipeline_mode = #tpu.pipeline_mode<synchronous>, transform_indices = @transform_5, window_bounds = array<i64: 1, 96>}, {pipeline_mode = #tpu.pipeline_mode<synchronous>, transform_indices = @transform_6, window_bounds = array<i64: 32, 32>}, {pipeline_mode = #tpu.pipeline_mode<synchronous>, transform_indices = @transform_7, window_bounds = array<i64: 1, 32>}, {pipeline_mode = #tpu.pipeline_mode<synchronous>, transform_indices = @transform_8, window_bounds = array<i64: 32, 32>}, {pipeline_mode = #tpu.pipeline_mode<synchronous>, transform_indices = @transform_9, window_bounds = array<i64: 1, 32>}, {pipeline_mode = #tpu.pipeline_mode<synchronous>, transform_indices = @transform_10, window_bounds = array<i64: 32, 64>}, {pipeline_mode = #tpu.pipeline_mode<synchronous>, transform_indices = @transform_11, window_bounds = array<i64: 1, 64>}, {pipeline_mode = #tpu.pipeline_mode<synchronous>, transform_indices = @transform_12, window_bounds = array<i64: 32, 32>}, {pipeline_mode = #tpu.pipeline_mode<synchronous>, transform_indices = @transform_13, window_bounds = array<i64: 1, 32>}, {pipeline_mode = #tpu.pipeline_mode<synchronous>, transform_indices = @transform_14, window_bounds = array<i64: 32, 64>}, {pipeline_mode = #tpu.pipeline_mode<synchronous>, transform_indices = @transform_15, window_bounds = array<i64: 1, 64>}, {pipeline_mode = #tpu.pipeline_mode<synchronous>, transform_indices = @transform_16, window_bounds = array<i64: 64, 32>}, {pipeline_mode = #tpu.pipeline_mode<synchronous>, transform_indices = @transform_17, window_bounds = array<i64: 1, 32>}, {pipeline_mode = #tpu.pipeline_mode<synchronous>, transform_indices = @transform_18, window_bounds = array<i64: 1, 32>}, {pipeline_mode = #tpu.pipeline_mode<synchronous>, transform_indices = @transform_19, window_bounds = array<i64: 1, 32>}, {pipeline_mode = #tpu.pipeline_mode<synchronous>, transform_indices = @transform_20, window_bounds = array<i64: 1, 32>}, {pipeline_mode = #tpu.pipeline_mode<synchronous>, transform_indices = @transform_21, window_bounds = array<i64: 1, 32>}, {pipeline_mode = #tpu.pipeline_mode<synchronous>, transform_indices = @transform_22, window_bounds = array<i64: 1, 32>}, {pipeline_mode = #tpu.pipeline_mode<synchronous>, transform_indices = @transform_23, window_bounds = array<i64: 1, 32>}, {transform_indices = @transform_24, window_bounds = array<i64: 1, 8, 32>}]} {
    %c0 = arith.constant 0 : index
    %c0_0 = arith.constant 0 : index
    %c0_1 = arith.constant 0 : index
    %0 = vector.load %arg1[%c0, %c0_0, %c0_1] : memref<1x8x32xf32, #tpu.memory_space<vmem>>, vector<1x8x32xf32>
    %1 = vector.shape_cast %0 : vector<1x8x32xf32> to vector<8x32xf32>
    %c0_2 = arith.constant 0 : index
    %c0_3 = arith.constant 0 : index
    %c0_4 = arith.constant 0 : index
    %2 = vector.load %arg2[%c0_2, %c0_3, %c0_4] : memref<1x8x32xf32, #tpu.memory_space<vmem>>, vector<1x8x32xf32>
    %3 = vector.shape_cast %2 : vector<1x8x32xf32> to vector<8x32xf32>
    %c0_5 = arith.constant 0 : index
    %c0_6 = arith.constant 0 : index
    %c0_7 = arith.constant 0 : index
    %4 = vector.load %arg3[%c0_5, %c0_6, %c0_7] : memref<1x8x8xi32, #tpu.memory_space<vmem>>, vector<1x8x8xi32>
    %5 = vector.shape_cast %4 : vector<1x8x8xi32> to vector<8x8xi32>
    %c0_8 = arith.constant 0 : index
    %c0_9 = arith.constant 0 : index
    %c0_10 = arith.constant 0 : index
    %6 = vector.load %arg4[%c0_8, %c0_9, %c0_10] : memref<1x1x8xi32, #tpu.memory_space<vmem>>, vector<1x1x8xi32>
    %7 = vector.shape_cast %6 : vector<1x1x8xi32> to vector<1x8xi32>
    %cst = arith.constant dense<0.000000e+00> : vector<8xf32>
    %8 = vector.multi_reduction <add>, %1, %cst [1] : vector<8x32xf32> to vector<8xf32>
    %9 = vector.shape_cast %8 : vector<8xf32> to vector<8x1xf32>
    %cst_11 = arith.constant 3.200000e+01 : f32
    %10 = vector.broadcast %cst_11 : f32 to vector<8x1xf32>
    %11 = arith.divf %9, %10 : vector<8x1xf32>
    %12 = vector.broadcast %11 : vector<8x1xf32> to vector<8x32xf32>
    %13 = arith.subf %1, %12 : vector<8x32xf32>
    %14 = arith.mulf %13, %13 : vector<8x32xf32>
    %cst_12 = arith.constant dense<0.000000e+00> : vector<8xf32>
    %15 = vector.multi_reduction <add>, %14, %cst_12 [1] : vector<8x32xf32> to vector<8xf32>
    %16 = vector.shape_cast %15 : vector<8xf32> to vector<8x1xf32>
    %cst_13 = arith.constant 3.100000e+01 : f32
    %17 = vector.broadcast %cst_13 : f32 to vector<8x1xf32>
    %18 = arith.divf %16, %17 : vector<8x1xf32>
    %19 = math.sqrt %18 : vector<8x1xf32>
    %c0_14 = arith.constant 0 : index
    %c0_15 = arith.constant 0 : index
    %20 = vector.load %arg19[%c0_14, %c0_15] : memref<1x32xf32, #tpu.memory_space<vmem>>, vector<1x32xf32>
    %21 = vector.shape_cast %20 : vector<1x32xf32> to vector<32xf32>
    %22 = vector.broadcast %11 : vector<8x1xf32> to vector<8x32xf32>
    %23 = arith.subf %1, %22 : vector<8x32xf32>
    %cst_16 = arith.constant 9.99999997E-7 : f32
    %24 = vector.broadcast %cst_16 : f32 to vector<8x1xf32>
    %25 = arith.addf %19, %24 : vector<8x1xf32>
    %26 = vector.broadcast %25 : vector<8x1xf32> to vector<8x32xf32>
    %27 = arith.divf %23, %26 : vector<8x32xf32>
    %28 = vector.shape_cast %21 : vector<32xf32> to vector<1x32xf32>
    %29 = vector.broadcast %28 : vector<1x32xf32> to vector<8x32xf32>
    %30 = arith.mulf %29, %27 : vector<8x32xf32>
    %c0_17 = arith.constant 0 : index
    %c0_18 = arith.constant 0 : index
    %31 = vector.load %arg20[%c0_17, %c0_18] : memref<1x32xf32, #tpu.memory_space<vmem>>, vector<1x32xf32>
    %32 = vector.shape_cast %31 : vector<1x32xf32> to vector<32xf32>
    %33 = vector.shape_cast %32 : vector<32xf32> to vector<1x32xf32>
    %34 = vector.broadcast %33 : vector<1x32xf32> to vector<8x32xf32>
    %35 = arith.addf %30, %34 : vector<8x32xf32>
    %c0_19 = arith.constant 0 : index
    %c0_20 = arith.constant 0 : index
    %36 = vector.load %arg5[%c0_19, %c0_20] : memref<32x96xf32, #tpu.memory_space<vmem>>, vector<32x96xf32>
    %cst_21 = arith.constant dense<0.000000e+00> : vector<8x96xf32>
    %37 = tpu.matmul %35, %36, %cst_21 {dimension_numbers = #tpu.dot_dimension_numbers<[1], [0], [0], [1], [0, 0, 1, 1], [], []>} : vector<8x32xf32>, vector<32x96xf32>, vector<8x96xf32> -> vector<8x96xf32>
    %c0_22 = arith.constant 0 : index
    %c0_23 = arith.constant 0 : index
    %38 = vector.load %arg6[%c0_22, %c0_23] : memref<1x96xf32, #tpu.memory_space<vmem>>, vector<1x96xf32>
    %39 = vector.shape_cast %38 : vector<1x96xf32> to vector<96xf32>
    %40 = vector.shape_cast %39 : vector<96xf32> to vector<1x96xf32>
    %41 = vector.broadcast %40 : vector<1x96xf32> to vector<8x96xf32>
    %42 = arith.addf %37, %41 : vector<8x96xf32>
    %43 = vector.extract_strided_slice %42 {offsets = [0, 0], sizes = [8, 32], strides = [1, 1]} : vector<8x96xf32> to vector<8x32xf32>
    %44 = vector.extract_strided_slice %42 {offsets = [0, 32], sizes = [8, 32], strides = [1, 1]} : vector<8x96xf32> to vector<8x32xf32>
    %45 = vector.extract_strided_slice %42 {offsets = [0, 64], sizes = [8, 32], strides = [1, 1]} : vector<8x96xf32> to vector<8x32xf32>
    %c0_i32 = arith.constant 0 : i32
    %46 = vector.broadcast %c0_i32 : i32 to vector<8x8xi32>
    %47 = arith.cmpi ne, %5, %46 : vector<8x8xi32>
    %48 = vector.extract_strided_slice %43 {offsets = [0, 0], sizes = [8, 8], strides = [1, 1]} : vector<8x32xf32> to vector<8x8xf32>
    %49 = vector.extract_strided_slice %44 {offsets = [0, 0], sizes = [8, 8], strides = [1, 1]} : vector<8x32xf32> to vector<8x8xf32>
    %50 = vector.extract_strided_slice %45 {offsets = [0, 0], sizes = [8, 8], strides = [1, 1]} : vector<8x32xf32> to vector<8x8xf32>
    %cst_24 = arith.constant dense<0.000000e+00> : vector<8x8xf32>
    %51 = tpu.matmul %48, %49, %cst_24 {dimension_numbers = #tpu.dot_dimension_numbers<[1], [1], [0], [0], [0, 0, 1, 0], [], []>} : vector<8x8xf32>, vector<8x8xf32>, vector<8x8xf32> -> vector<8x8xf32>
    %cst_25 = arith.constant 0.353553385 : f32
    %52 = vector.broadcast %cst_25 : f32 to vector<8x8xf32>
    %53 = arith.mulf %51, %52 : vector<8x8xf32>
    %cst_26 = arith.constant -1.000000e+09 : f32
    %54 = vector.broadcast %cst_26 : f32 to vector<8x8xf32>
    %55 = arith.select %47, %53, %54 : vector<8x8xi1>, vector<8x8xf32>
    %cst_27 = arith.constant dense<0xFF800000> : vector<8xf32>
    %56 = vector.multi_reduction <maximumf>, %55, %cst_27 [1] : vector<8x8xf32> to vector<8xf32>
    %57 = vector.shape_cast %56 : vector<8xf32> to vector<8x1xf32>
    %58 = vector.broadcast %57 : vector<8x1xf32> to vector<8x8xf32>
    %59 = arith.subf %55, %58 : vector<8x8xf32>
    %60 = math.exp %59 : vector<8x8xf32>
    %cst_28 = arith.constant dense<0.000000e+00> : vector<8xf32>
    %61 = vector.multi_reduction <add>, %60, %cst_28 [1] : vector<8x8xf32> to vector<8xf32>
    %62 = vector.shape_cast %61 : vector<8xf32> to vector<8x1xf32>
    %63 = tpu.reciprocal %62 {approx = true} : vector<8x1xf32> -> vector<8x1xf32>
    %64 = vector.broadcast %63 : vector<8x1xf32> to vector<8x8xf32>
    %65 = arith.mulf %60, %64 : vector<8x8xf32>
    %cst_29 = arith.constant dense<0.000000e+00> : vector<8x8xf32>
    %66 = tpu.matmul %65, %50, %cst_29 {dimension_numbers = #tpu.dot_dimension_numbers<[1], [0], [0], [1], [0, 0, 1, 1], [], []>} : vector<8x8xf32>, vector<8x8xf32>, vector<8x8xf32> -> vector<8x8xf32>
    %67 = vector.extract_strided_slice %43 {offsets = [0, 8], sizes = [8, 8], strides = [1, 1]} : vector<8x32xf32> to vector<8x8xf32>
    %68 = vector.extract_strided_slice %44 {offsets = [0, 8], sizes = [8, 8], strides = [1, 1]} : vector<8x32xf32> to vector<8x8xf32>
    %69 = vector.extract_strided_slice %45 {offsets = [0, 8], sizes = [8, 8], strides = [1, 1]} : vector<8x32xf32> to vector<8x8xf32>
    %cst_30 = arith.constant dense<0.000000e+00> : vector<8x8xf32>
    %70 = tpu.matmul %67, %68, %cst_30 {dimension_numbers = #tpu.dot_dimension_numbers<[1], [1], [0], [0], [0, 0, 1, 0], [], []>} : vector<8x8xf32>, vector<8x8xf32>, vector<8x8xf32> -> vector<8x8xf32>
    %cst_31 = arith.constant 0.353553385 : f32
    %71 = vector.broadcast %cst_31 : f32 to vector<8x8xf32>
    %72 = arith.mulf %70, %71 : vector<8x8xf32>
    %cst_32 = arith.constant -1.000000e+09 : f32
    %73 = vector.broadcast %cst_32 : f32 to vector<8x8xf32>
    %74 = arith.select %47, %72, %73 : vector<8x8xi1>, vector<8x8xf32>
    %cst_33 = arith.constant dense<0xFF800000> : vector<8xf32>
    %75 = vector.multi_reduction <maximumf>, %74, %cst_33 [1] : vector<8x8xf32> to vector<8xf32>
    %76 = vector.shape_cast %75 : vector<8xf32> to vector<8x1xf32>
    %77 = vector.broadcast %76 : vector<8x1xf32> to vector<8x8xf32>
    %78 = arith.subf %74, %77 : vector<8x8xf32>
    %79 = math.exp %78 : vector<8x8xf32>
    %cst_34 = arith.constant dense<0.000000e+00> : vector<8xf32>
    %80 = vector.multi_reduction <add>, %79, %cst_34 [1] : vector<8x8xf32> to vector<8xf32>
    %81 = vector.shape_cast %80 : vector<8xf32> to vector<8x1xf32>
    %82 = tpu.reciprocal %81 {approx = true} : vector<8x1xf32> -> vector<8x1xf32>
    %83 = vector.broadcast %82 : vector<8x1xf32> to vector<8x8xf32>
    %84 = arith.mulf %79, %83 : vector<8x8xf32>
    %cst_35 = arith.constant dense<0.000000e+00> : vector<8x8xf32>
    %85 = tpu.matmul %84, %69, %cst_35 {dimension_numbers = #tpu.dot_dimension_numbers<[1], [0], [0], [1], [0, 0, 1, 1], [], []>} : vector<8x8xf32>, vector<8x8xf32>, vector<8x8xf32> -> vector<8x8xf32>
    %86 = vector.extract_strided_slice %43 {offsets = [0, 16], sizes = [8, 8], strides = [1, 1]} : vector<8x32xf32> to vector<8x8xf32>
    %87 = vector.extract_strided_slice %44 {offsets = [0, 16], sizes = [8, 8], strides = [1, 1]} : vector<8x32xf32> to vector<8x8xf32>
    %88 = vector.extract_strided_slice %45 {offsets = [0, 16], sizes = [8, 8], strides = [1, 1]} : vector<8x32xf32> to vector<8x8xf32>
    %cst_36 = arith.constant dense<0.000000e+00> : vector<8x8xf32>
    %89 = tpu.matmul %86, %87, %cst_36 {dimension_numbers = #tpu.dot_dimension_numbers<[1], [1], [0], [0], [0, 0, 1, 0], [], []>} : vector<8x8xf32>, vector<8x8xf32>, vector<8x8xf32> -> vector<8x8xf32>
    %cst_37 = arith.constant 0.353553385 : f32
    %90 = vector.broadcast %cst_37 : f32 to vector<8x8xf32>
    %91 = arith.mulf %89, %90 : vector<8x8xf32>
    %cst_38 = arith.constant -1.000000e+09 : f32
    %92 = vector.broadcast %cst_38 : f32 to vector<8x8xf32>
    %93 = arith.select %47, %91, %92 : vector<8x8xi1>, vector<8x8xf32>
    %cst_39 = arith.constant dense<0xFF800000> : vector<8xf32>
    %94 = vector.multi_reduction <maximumf>, %93, %cst_39 [1] : vector<8x8xf32> to vector<8xf32>
    %95 = vector.shape_cast %94 : vector<8xf32> to vector<8x1xf32>
    %96 = vector.broadcast %95 : vector<8x1xf32> to vector<8x8xf32>
    %97 = arith.subf %93, %96 : vector<8x8xf32>
    %98 = math.exp %97 : vector<8x8xf32>
    %cst_40 = arith.constant dense<0.000000e+00> : vector<8xf32>
    %99 = vector.multi_reduction <add>, %98, %cst_40 [1] : vector<8x8xf32> to vector<8xf32>
    %100 = vector.shape_cast %99 : vector<8xf32> to vector<8x1xf32>
    %101 = tpu.reciprocal %100 {approx = true} : vector<8x1xf32> -> vector<8x1xf32>
    %102 = vector.broadcast %101 : vector<8x1xf32> to vector<8x8xf32>
    %103 = arith.mulf %98, %102 : vector<8x8xf32>
    %cst_41 = arith.constant dense<0.000000e+00> : vector<8x8xf32>
    %104 = tpu.matmul %103, %88, %cst_41 {dimension_numbers = #tpu.dot_dimension_numbers<[1], [0], [0], [1], [0, 0, 1, 1], [], []>} : vector<8x8xf32>, vector<8x8xf32>, vector<8x8xf32> -> vector<8x8xf32>
    %105 = vector.extract_strided_slice %43 {offsets = [0, 24], sizes = [8, 8], strides = [1, 1]} : vector<8x32xf32> to vector<8x8xf32>
    %106 = vector.extract_strided_slice %44 {offsets = [0, 24], sizes = [8, 8], strides = [1, 1]} : vector<8x32xf32> to vector<8x8xf32>
    %107 = vector.extract_strided_slice %45 {offsets = [0, 24], sizes = [8, 8], strides = [1, 1]} : vector<8x32xf32> to vector<8x8xf32>
    %cst_42 = arith.constant dense<0.000000e+00> : vector<8x8xf32>
    %108 = tpu.matmul %105, %106, %cst_42 {dimension_numbers = #tpu.dot_dimension_numbers<[1], [1], [0], [0], [0, 0, 1, 0], [], []>} : vector<8x8xf32>, vector<8x8xf32>, vector<8x8xf32> -> vector<8x8xf32>
    %cst_43 = arith.constant 0.353553385 : f32
    %109 = vector.broadcast %cst_43 : f32 to vector<8x8xf32>
    %110 = arith.mulf %108, %109 : vector<8x8xf32>
    %cst_44 = arith.constant -1.000000e+09 : f32
    %111 = vector.broadcast %cst_44 : f32 to vector<8x8xf32>
    %112 = arith.select %47, %110, %111 : vector<8x8xi1>, vector<8x8xf32>
    %cst_45 = arith.constant dense<0xFF800000> : vector<8xf32>
    %113 = vector.multi_reduction <maximumf>, %112, %cst_45 [1] : vector<8x8xf32> to vector<8xf32>
    %114 = vector.shape_cast %113 : vector<8xf32> to vector<8x1xf32>
    %115 = vector.broadcast %114 : vector<8x1xf32> to vector<8x8xf32>
    %116 = arith.subf %112, %115 : vector<8x8xf32>
    %117 = math.exp %116 : vector<8x8xf32>
    %cst_46 = arith.constant dense<0.000000e+00> : vector<8xf32>
    %118 = vector.multi_reduction <add>, %117, %cst_46 [1] : vector<8x8xf32> to vector<8xf32>
    %119 = vector.shape_cast %118 : vector<8xf32> to vector<8x1xf32>
    %120 = tpu.reciprocal %119 {approx = true} : vector<8x1xf32> -> vector<8x1xf32>
    %121 = vector.broadcast %120 : vector<8x1xf32> to vector<8x8xf32>
    %122 = arith.mulf %117, %121 : vector<8x8xf32>
    %cst_47 = arith.constant dense<0.000000e+00> : vector<8x8xf32>
    %123 = tpu.matmul %122, %107, %cst_47 {dimension_numbers = #tpu.dot_dimension_numbers<[1], [0], [0], [1], [0, 0, 1, 1], [], []>} : vector<8x8xf32>, vector<8x8xf32>, vector<8x8xf32> -> vector<8x8xf32>
    %124 = tpu.concatenate %66, %85, %104, %123 in 1 : vector<8x8xf32>, vector<8x8xf32>, vector<8x8xf32>, vector<8x8xf32> -> vector<8x32xf32>
    %c0_48 = arith.constant 0 : index
    %c0_49 = arith.constant 0 : index
    %125 = vector.load %arg7[%c0_48, %c0_49] : memref<32x32xf32, #tpu.memory_space<vmem>>, vector<32x32xf32>
    %cst_50 = arith.constant dense<0.000000e+00> : vector<8x32xf32>
    %126 = tpu.matmul %124, %125, %cst_50 {dimension_numbers = #tpu.dot_dimension_numbers<[1], [0], [0], [1], [0, 0, 1, 1], [], []>} : vector<8x32xf32>, vector<32x32xf32>, vector<8x32xf32> -> vector<8x32xf32>
    %c0_51 = arith.constant 0 : index
    %c0_52 = arith.constant 0 : index
    %127 = vector.load %arg8[%c0_51, %c0_52] : memref<1x32xf32, #tpu.memory_space<vmem>>, vector<1x32xf32>
    %128 = vector.shape_cast %127 : vector<1x32xf32> to vector<32xf32>
    %129 = vector.shape_cast %128 : vector<32xf32> to vector<1x32xf32>
    %130 = vector.broadcast %129 : vector<1x32xf32> to vector<8x32xf32>
    %131 = arith.addf %126, %130 : vector<8x32xf32>
    %132 = arith.addf %1, %131 : vector<8x32xf32>
    %cst_53 = arith.constant dense<0.000000e+00> : vector<8xf32>
    %133 = vector.multi_reduction <add>, %132, %cst_53 [1] : vector<8x32xf32> to vector<8xf32>
    %134 = vector.shape_cast %133 : vector<8xf32> to vector<8x1xf32>
    %cst_54 = arith.constant 3.200000e+01 : f32
    %135 = vector.broadcast %cst_54 : f32 to vector<8x1xf32>
    %136 = arith.divf %134, %135 : vector<8x1xf32>
    %137 = vector.broadcast %136 : vector<8x1xf32> to vector<8x32xf32>
    %138 = arith.subf %132, %137 : vector<8x32xf32>
    %139 = arith.mulf %138, %138 : vector<8x32xf32>
    %cst_55 = arith.constant dense<0.000000e+00> : vector<8xf32>
    %140 = vector.multi_reduction <add>, %139, %cst_55 [1] : vector<8x32xf32> to vector<8xf32>
    %141 = vector.shape_cast %140 : vector<8xf32> to vector<8x1xf32>
    %cst_56 = arith.constant 3.100000e+01 : f32
    %142 = vector.broadcast %cst_56 : f32 to vector<8x1xf32>
    %143 = arith.divf %141, %142 : vector<8x1xf32>
    %144 = math.sqrt %143 : vector<8x1xf32>
    %c0_57 = arith.constant 0 : index
    %c0_58 = arith.constant 0 : index
    %145 = vector.load %arg21[%c0_57, %c0_58] : memref<1x32xf32, #tpu.memory_space<vmem>>, vector<1x32xf32>
    %146 = vector.shape_cast %145 : vector<1x32xf32> to vector<32xf32>
    %147 = vector.broadcast %136 : vector<8x1xf32> to vector<8x32xf32>
    %148 = arith.subf %132, %147 : vector<8x32xf32>
    %cst_59 = arith.constant 9.99999997E-7 : f32
    %149 = vector.broadcast %cst_59 : f32 to vector<8x1xf32>
    %150 = arith.addf %144, %149 : vector<8x1xf32>
    %151 = vector.broadcast %150 : vector<8x1xf32> to vector<8x32xf32>
    %152 = arith.divf %148, %151 : vector<8x32xf32>
    %153 = vector.shape_cast %146 : vector<32xf32> to vector<1x32xf32>
    %154 = vector.broadcast %153 : vector<1x32xf32> to vector<8x32xf32>
    %155 = arith.mulf %154, %152 : vector<8x32xf32>
    %c0_60 = arith.constant 0 : index
    %c0_61 = arith.constant 0 : index
    %156 = vector.load %arg22[%c0_60, %c0_61] : memref<1x32xf32, #tpu.memory_space<vmem>>, vector<1x32xf32>
    %157 = vector.shape_cast %156 : vector<1x32xf32> to vector<32xf32>
    %158 = vector.shape_cast %157 : vector<32xf32> to vector<1x32xf32>
    %159 = vector.broadcast %158 : vector<1x32xf32> to vector<8x32xf32>
    %160 = arith.addf %155, %159 : vector<8x32xf32>
    %c0_62 = arith.constant 0 : index
    %c0_63 = arith.constant 0 : index
    %161 = vector.load %arg9[%c0_62, %c0_63] : memref<32x32xf32, #tpu.memory_space<vmem>>, vector<32x32xf32>
    %cst_64 = arith.constant dense<0.000000e+00> : vector<8x32xf32>
    %162 = tpu.matmul %160, %161, %cst_64 {dimension_numbers = #tpu.dot_dimension_numbers<[1], [0], [0], [1], [0, 0, 1, 1], [], []>} : vector<8x32xf32>, vector<32x32xf32>, vector<8x32xf32> -> vector<8x32xf32>
    %c0_65 = arith.constant 0 : index
    %c0_66 = arith.constant 0 : index
    %163 = vector.load %arg10[%c0_65, %c0_66] : memref<1x32xf32, #tpu.memory_space<vmem>>, vector<1x32xf32>
    %164 = vector.shape_cast %163 : vector<1x32xf32> to vector<32xf32>
    %165 = vector.shape_cast %164 : vector<32xf32> to vector<1x32xf32>
    %166 = vector.broadcast %165 : vector<1x32xf32> to vector<8x32xf32>
    %167 = arith.addf %162, %166 : vector<8x32xf32>
    %c0_67 = arith.constant 0 : index
    %c0_68 = arith.constant 0 : index
    %168 = vector.load %arg11[%c0_67, %c0_68] : memref<32x64xf32, #tpu.memory_space<vmem>>, vector<32x64xf32>
    %cst_69 = arith.constant dense<0.000000e+00> : vector<8x64xf32>
    %169 = tpu.matmul %3, %168, %cst_69 {dimension_numbers = #tpu.dot_dimension_numbers<[1], [0], [0], [1], [0, 0, 1, 1], [], []>} : vector<8x32xf32>, vector<32x64xf32>, vector<8x64xf32> -> vector<8x64xf32>
    %c0_70 = arith.constant 0 : index
    %c0_71 = arith.constant 0 : index
    %170 = vector.load %arg12[%c0_70, %c0_71] : memref<1x64xf32, #tpu.memory_space<vmem>>, vector<1x64xf32>
    %171 = vector.shape_cast %170 : vector<1x64xf32> to vector<64xf32>
    %172 = vector.shape_cast %171 : vector<64xf32> to vector<1x64xf32>
    %173 = vector.broadcast %172 : vector<1x64xf32> to vector<8x64xf32>
    %174 = arith.addf %169, %173 : vector<8x64xf32>
    %175 = vector.extract_strided_slice %174 {offsets = [0, 0], sizes = [8, 32], strides = [1, 1]} : vector<8x64xf32> to vector<8x32xf32>
    %176 = vector.extract_strided_slice %174 {offsets = [0, 32], sizes = [8, 32], strides = [1, 1]} : vector<8x64xf32> to vector<8x32xf32>
    %c0_i32_72 = arith.constant 0 : i32
    %177 = vector.broadcast %c0_i32_72 : i32 to vector<1x8xi32>
    %178 = arith.cmpi ne, %7, %177 : vector<1x8xi32>
    %179 = vector.shape_cast %178 : vector<1x8xi1> to vector<1x8xi1>
    %180 = vector.broadcast %179 : vector<1x8xi1> to vector<8x8xi1>
    %181 = vector.extract_strided_slice %167 {offsets = [0, 0], sizes = [8, 8], strides = [1, 1]} : vector<8x32xf32> to vector<8x8xf32>
    %182 = vector.extract_strided_slice %175 {offsets = [0, 0], sizes = [8, 8], strides = [1, 1]} : vector<8x32xf32> to vector<8x8xf32>
    %183 = vector.extract_strided_slice %176 {offsets = [0, 0], sizes = [8, 8], strides = [1, 1]} : vector<8x32xf32> to vector<8x8xf32>
    %cst_73 = arith.constant dense<0.000000e+00> : vector<8x8xf32>
    %184 = tpu.matmul %181, %182, %cst_73 {dimension_numbers = #tpu.dot_dimension_numbers<[1], [1], [0], [0], [0, 0, 1, 0], [], []>} : vector<8x8xf32>, vector<8x8xf32>, vector<8x8xf32> -> vector<8x8xf32>
    %cst_74 = arith.constant 0.353553385 : f32
    %185 = vector.broadcast %cst_74 : f32 to vector<8x8xf32>
    %186 = arith.mulf %184, %185 : vector<8x8xf32>
    %cst_75 = arith.constant -1.000000e+09 : f32
    %187 = vector.broadcast %cst_75 : f32 to vector<8x8xf32>
    %188 = arith.select %180, %186, %187 : vector<8x8xi1>, vector<8x8xf32>
    %cst_76 = arith.constant dense<0xFF800000> : vector<8xf32>
    %189 = vector.multi_reduction <maximumf>, %188, %cst_76 [1] : vector<8x8xf32> to vector<8xf32>
    %190 = vector.shape_cast %189 : vector<8xf32> to vector<8x1xf32>
    %191 = vector.broadcast %190 : vector<8x1xf32> to vector<8x8xf32>
    %192 = arith.subf %188, %191 : vector<8x8xf32>
    %193 = math.exp %192 : vector<8x8xf32>
    %cst_77 = arith.constant dense<0.000000e+00> : vector<8xf32>
    %194 = vector.multi_reduction <add>, %193, %cst_77 [1] : vector<8x8xf32> to vector<8xf32>
    %195 = vector.shape_cast %194 : vector<8xf32> to vector<8x1xf32>
    %196 = tpu.reciprocal %195 {approx = true} : vector<8x1xf32> -> vector<8x1xf32>
    %197 = vector.broadcast %196 : vector<8x1xf32> to vector<8x8xf32>
    %198 = arith.mulf %193, %197 : vector<8x8xf32>
    %cst_78 = arith.constant dense<0.000000e+00> : vector<8x8xf32>
    %199 = tpu.matmul %198, %183, %cst_78 {dimension_numbers = #tpu.dot_dimension_numbers<[1], [0], [0], [1], [0, 0, 1, 1], [], []>} : vector<8x8xf32>, vector<8x8xf32>, vector<8x8xf32> -> vector<8x8xf32>
    %200 = vector.extract_strided_slice %167 {offsets = [0, 8], sizes = [8, 8], strides = [1, 1]} : vector<8x32xf32> to vector<8x8xf32>
    %201 = vector.extract_strided_slice %175 {offsets = [0, 8], sizes = [8, 8], strides = [1, 1]} : vector<8x32xf32> to vector<8x8xf32>
    %202 = vector.extract_strided_slice %176 {offsets = [0, 8], sizes = [8, 8], strides = [1, 1]} : vector<8x32xf32> to vector<8x8xf32>
    %cst_79 = arith.constant dense<0.000000e+00> : vector<8x8xf32>
    %203 = tpu.matmul %200, %201, %cst_79 {dimension_numbers = #tpu.dot_dimension_numbers<[1], [1], [0], [0], [0, 0, 1, 0], [], []>} : vector<8x8xf32>, vector<8x8xf32>, vector<8x8xf32> -> vector<8x8xf32>
    %cst_80 = arith.constant 0.353553385 : f32
    %204 = vector.broadcast %cst_80 : f32 to vector<8x8xf32>
    %205 = arith.mulf %203, %204 : vector<8x8xf32>
    %cst_81 = arith.constant -1.000000e+09 : f32
    %206 = vector.broadcast %cst_81 : f32 to vector<8x8xf32>
    %207 = arith.select %180, %205, %206 : vector<8x8xi1>, vector<8x8xf32>
    %cst_82 = arith.constant dense<0xFF800000> : vector<8xf32>
    %208 = vector.multi_reduction <maximumf>, %207, %cst_82 [1] : vector<8x8xf32> to vector<8xf32>
    %209 = vector.shape_cast %208 : vector<8xf32> to vector<8x1xf32>
    %210 = vector.broadcast %209 : vector<8x1xf32> to vector<8x8xf32>
    %211 = arith.subf %207, %210 : vector<8x8xf32>
    %212 = math.exp %211 : vector<8x8xf32>
    %cst_83 = arith.constant dense<0.000000e+00> : vector<8xf32>
    %213 = vector.multi_reduction <add>, %212, %cst_83 [1] : vector<8x8xf32> to vector<8xf32>
    %214 = vector.shape_cast %213 : vector<8xf32> to vector<8x1xf32>
    %215 = tpu.reciprocal %214 {approx = true} : vector<8x1xf32> -> vector<8x1xf32>
    %216 = vector.broadcast %215 : vector<8x1xf32> to vector<8x8xf32>
    %217 = arith.mulf %212, %216 : vector<8x8xf32>
    %cst_84 = arith.constant dense<0.000000e+00> : vector<8x8xf32>
    %218 = tpu.matmul %217, %202, %cst_84 {dimension_numbers = #tpu.dot_dimension_numbers<[1], [0], [0], [1], [0, 0, 1, 1], [], []>} : vector<8x8xf32>, vector<8x8xf32>, vector<8x8xf32> -> vector<8x8xf32>
    %219 = vector.extract_strided_slice %167 {offsets = [0, 16], sizes = [8, 8], strides = [1, 1]} : vector<8x32xf32> to vector<8x8xf32>
    %220 = vector.extract_strided_slice %175 {offsets = [0, 16], sizes = [8, 8], strides = [1, 1]} : vector<8x32xf32> to vector<8x8xf32>
    %221 = vector.extract_strided_slice %176 {offsets = [0, 16], sizes = [8, 8], strides = [1, 1]} : vector<8x32xf32> to vector<8x8xf32>
    %cst_85 = arith.constant dense<0.000000e+00> : vector<8x8xf32>
    %222 = tpu.matmul %219, %220, %cst_85 {dimension_numbers = #tpu.dot_dimension_numbers<[1], [1], [0], [0], [0, 0, 1, 0], [], []>} : vector<8x8xf32>, vector<8x8xf32>, vector<8x8xf32> -> vector<8x8xf32>
    %cst_86 = arith.constant 0.353553385 : f32
    %223 = vector.broadcast %cst_86 : f32 to vector<8x8xf32>
    %224 = arith.mulf %222, %223 : vector<8x8xf32>
    %cst_87 = arith.constant -1.000000e+09 : f32
    %225 = vector.broadcast %cst_87 : f32 to vector<8x8xf32>
    %226 = arith.select %180, %224, %225 : vector<8x8xi1>, vector<8x8xf32>
    %cst_88 = arith.constant dense<0xFF800000> : vector<8xf32>
    %227 = vector.multi_reduction <maximumf>, %226, %cst_88 [1] : vector<8x8xf32> to vector<8xf32>
    %228 = vector.shape_cast %227 : vector<8xf32> to vector<8x1xf32>
    %229 = vector.broadcast %228 : vector<8x1xf32> to vector<8x8xf32>
    %230 = arith.subf %226, %229 : vector<8x8xf32>
    %231 = math.exp %230 : vector<8x8xf32>
    %cst_89 = arith.constant dense<0.000000e+00> : vector<8xf32>
    %232 = vector.multi_reduction <add>, %231, %cst_89 [1] : vector<8x8xf32> to vector<8xf32>
    %233 = vector.shape_cast %232 : vector<8xf32> to vector<8x1xf32>
    %234 = tpu.reciprocal %233 {approx = true} : vector<8x1xf32> -> vector<8x1xf32>
    %235 = vector.broadcast %234 : vector<8x1xf32> to vector<8x8xf32>
    %236 = arith.mulf %231, %235 : vector<8x8xf32>
    %cst_90 = arith.constant dense<0.000000e+00> : vector<8x8xf32>
    %237 = tpu.matmul %236, %221, %cst_90 {dimension_numbers = #tpu.dot_dimension_numbers<[1], [0], [0], [1], [0, 0, 1, 1], [], []>} : vector<8x8xf32>, vector<8x8xf32>, vector<8x8xf32> -> vector<8x8xf32>
    %238 = vector.extract_strided_slice %167 {offsets = [0, 24], sizes = [8, 8], strides = [1, 1]} : vector<8x32xf32> to vector<8x8xf32>
    %239 = vector.extract_strided_slice %175 {offsets = [0, 24], sizes = [8, 8], strides = [1, 1]} : vector<8x32xf32> to vector<8x8xf32>
    %240 = vector.extract_strided_slice %176 {offsets = [0, 24], sizes = [8, 8], strides = [1, 1]} : vector<8x32xf32> to vector<8x8xf32>
    %cst_91 = arith.constant dense<0.000000e+00> : vector<8x8xf32>
    %241 = tpu.matmul %238, %239, %cst_91 {dimension_numbers = #tpu.dot_dimension_numbers<[1], [1], [0], [0], [0, 0, 1, 0], [], []>} : vector<8x8xf32>, vector<8x8xf32>, vector<8x8xf32> -> vector<8x8xf32>
    %cst_92 = arith.constant 0.353553385 : f32
    %242 = vector.broadcast %cst_92 : f32 to vector<8x8xf32>
    %243 = arith.mulf %241, %242 : vector<8x8xf32>
    %cst_93 = arith.constant -1.000000e+09 : f32
    %244 = vector.broadcast %cst_93 : f32 to vector<8x8xf32>
    %245 = arith.select %180, %243, %244 : vector<8x8xi1>, vector<8x8xf32>
    %cst_94 = arith.constant dense<0xFF800000> : vector<8xf32>
    %246 = vector.multi_reduction <maximumf>, %245, %cst_94 [1] : vector<8x8xf32> to vector<8xf32>
    %247 = vector.shape_cast %246 : vector<8xf32> to vector<8x1xf32>
    %248 = vector.broadcast %247 : vector<8x1xf32> to vector<8x8xf32>
    %249 = arith.subf %245, %248 : vector<8x8xf32>
    %250 = math.exp %249 : vector<8x8xf32>
    %cst_95 = arith.constant dense<0.000000e+00> : vector<8xf32>
    %251 = vector.multi_reduction <add>, %250, %cst_95 [1] : vector<8x8xf32> to vector<8xf32>
    %252 = vector.shape_cast %251 : vector<8xf32> to vector<8x1xf32>
    %253 = tpu.reciprocal %252 {approx = true} : vector<8x1xf32> -> vector<8x1xf32>
    %254 = vector.broadcast %253 : vector<8x1xf32> to vector<8x8xf32>
    %255 = arith.mulf %250, %254 : vector<8x8xf32>
    %cst_96 = arith.constant dense<0.000000e+00> : vector<8x8xf32>
    %256 = tpu.matmul %255, %240, %cst_96 {dimension_numbers = #tpu.dot_dimension_numbers<[1], [0], [0], [1], [0, 0, 1, 1], [], []>} : vector<8x8xf32>, vector<8x8xf32>, vector<8x8xf32> -> vector<8x8xf32>
    %257 = tpu.concatenate %199, %218, %237, %256 in 1 : vector<8x8xf32>, vector<8x8xf32>, vector<8x8xf32>, vector<8x8xf32> -> vector<8x32xf32>
    %c0_97 = arith.constant 0 : index
    %c0_98 = arith.constant 0 : index
    %258 = vector.load %arg13[%c0_97, %c0_98] : memref<32x32xf32, #tpu.memory_space<vmem>>, vector<32x32xf32>
    %cst_99 = arith.constant dense<0.000000e+00> : vector<8x32xf32>
    %259 = tpu.matmul %257, %258, %cst_99 {dimension_numbers = #tpu.dot_dimension_numbers<[1], [0], [0], [1], [0, 0, 1, 1], [], []>} : vector<8x32xf32>, vector<32x32xf32>, vector<8x32xf32> -> vector<8x32xf32>
    %c0_100 = arith.constant 0 : index
    %c0_101 = arith.constant 0 : index
    %260 = vector.load %arg14[%c0_100, %c0_101] : memref<1x32xf32, #tpu.memory_space<vmem>>, vector<1x32xf32>
    %261 = vector.shape_cast %260 : vector<1x32xf32> to vector<32xf32>
    %262 = vector.shape_cast %261 : vector<32xf32> to vector<1x32xf32>
    %263 = vector.broadcast %262 : vector<1x32xf32> to vector<8x32xf32>
    %264 = arith.addf %259, %263 : vector<8x32xf32>
    %265 = arith.addf %132, %264 : vector<8x32xf32>
    %cst_102 = arith.constant dense<0.000000e+00> : vector<8xf32>
    %266 = vector.multi_reduction <add>, %265, %cst_102 [1] : vector<8x32xf32> to vector<8xf32>
    %267 = vector.shape_cast %266 : vector<8xf32> to vector<8x1xf32>
    %cst_103 = arith.constant 3.200000e+01 : f32
    %268 = vector.broadcast %cst_103 : f32 to vector<8x1xf32>
    %269 = arith.divf %267, %268 : vector<8x1xf32>
    %270 = vector.broadcast %269 : vector<8x1xf32> to vector<8x32xf32>
    %271 = arith.subf %265, %270 : vector<8x32xf32>
    %272 = arith.mulf %271, %271 : vector<8x32xf32>
    %cst_104 = arith.constant dense<0.000000e+00> : vector<8xf32>
    %273 = vector.multi_reduction <add>, %272, %cst_104 [1] : vector<8x32xf32> to vector<8xf32>
    %274 = vector.shape_cast %273 : vector<8xf32> to vector<8x1xf32>
    %cst_105 = arith.constant 3.100000e+01 : f32
    %275 = vector.broadcast %cst_105 : f32 to vector<8x1xf32>
    %276 = arith.divf %274, %275 : vector<8x1xf32>
    %277 = math.sqrt %276 : vector<8x1xf32>
    %c0_106 = arith.constant 0 : index
    %c0_107 = arith.constant 0 : index
    %278 = vector.load %arg23[%c0_106, %c0_107] : memref<1x32xf32, #tpu.memory_space<vmem>>, vector<1x32xf32>
    %279 = vector.shape_cast %278 : vector<1x32xf32> to vector<32xf32>
    %280 = vector.broadcast %269 : vector<8x1xf32> to vector<8x32xf32>
    %281 = arith.subf %265, %280 : vector<8x32xf32>
    %cst_108 = arith.constant 9.99999997E-7 : f32
    %282 = vector.broadcast %cst_108 : f32 to vector<8x1xf32>
    %283 = arith.addf %277, %282 : vector<8x1xf32>
    %284 = vector.broadcast %283 : vector<8x1xf32> to vector<8x32xf32>
    %285 = arith.divf %281, %284 : vector<8x32xf32>
    %286 = vector.shape_cast %279 : vector<32xf32> to vector<1x32xf32>
    %287 = vector.broadcast %286 : vector<1x32xf32> to vector<8x32xf32>
    %288 = arith.mulf %287, %285 : vector<8x32xf32>
    %c0_109 = arith.constant 0 : index
    %c0_110 = arith.constant 0 : index
    %289 = vector.load %arg24[%c0_109, %c0_110] : memref<1x32xf32, #tpu.memory_space<vmem>>, vector<1x32xf32>
    %290 = vector.shape_cast %289 : vector<1x32xf32> to vector<32xf32>
    %291 = vector.shape_cast %290 : vector<32xf32> to vector<1x32xf32>
    %292 = vector.broadcast %291 : vector<1x32xf32> to vector<8x32xf32>
    %293 = arith.addf %288, %292 : vector<8x32xf32>
    %c0_111 = arith.constant 0 : index
    %c0_112 = arith.constant 0 : index
    %294 = vector.load %arg15[%c0_111, %c0_112] : memref<32x64xf32, #tpu.memory_space<vmem>>, vector<32x64xf32>
    %cst_113 = arith.constant dense<0.000000e+00> : vector<8x64xf32>
    %295 = tpu.matmul %293, %294, %cst_113 {dimension_numbers = #tpu.dot_dimension_numbers<[1], [0], [0], [1], [0, 0, 1, 1], [], []>} : vector<8x32xf32>, vector<32x64xf32>, vector<8x64xf32> -> vector<8x64xf32>
    %c0_114 = arith.constant 0 : index
    %c0_115 = arith.constant 0 : index
    %296 = vector.load %arg16[%c0_114, %c0_115] : memref<1x64xf32, #tpu.memory_space<vmem>>, vector<1x64xf32>
    %297 = vector.shape_cast %296 : vector<1x64xf32> to vector<64xf32>
    %298 = vector.shape_cast %297 : vector<64xf32> to vector<1x64xf32>
    %299 = vector.broadcast %298 : vector<1x64xf32> to vector<8x64xf32>
    %300 = arith.addf %295, %299 : vector<8x64xf32>
    %cst_116 = arith.constant 0.000000e+00 : f32
    %301 = vector.broadcast %cst_116 : f32 to vector<8x64xf32>
    %302 = arith.maximumf %300, %301 : vector<8x64xf32>
    %c0_117 = arith.constant 0 : index
    %c0_118 = arith.constant 0 : index
    %303 = vector.load %arg17[%c0_117, %c0_118] : memref<64x32xf32, #tpu.memory_space<vmem>>, vector<64x32xf32>
    %cst_119 = arith.constant dense<0.000000e+00> : vector<8x32xf32>
    %304 = tpu.matmul %302, %303, %cst_119 {dimension_numbers = #tpu.dot_dimension_numbers<[1], [0], [0], [1], [0, 0, 1, 1], [], []>} : vector<8x64xf32>, vector<64x32xf32>, vector<8x32xf32> -> vector<8x32xf32>
    %c0_120 = arith.constant 0 : index
    %c0_121 = arith.constant 0 : index
    %305 = vector.load %arg18[%c0_120, %c0_121] : memref<1x32xf32, #tpu.memory_space<vmem>>, vector<1x32xf32>
    %306 = vector.shape_cast %305 : vector<1x32xf32> to vector<32xf32>
    %307 = vector.shape_cast %306 : vector<32xf32> to vector<1x32xf32>
    %308 = vector.broadcast %307 : vector<1x32xf32> to vector<8x32xf32>
    %309 = arith.addf %304, %308 : vector<8x32xf32>
    %310 = arith.addf %265, %309 : vector<8x32xf32>
    %c0_122 = arith.constant 0 : index
    %c0_123 = arith.constant 0 : index
    %c0_124 = arith.constant 0 : index
    %311 = vector.load %arg25[%c0_122, %c0_123, %c0_124] : memref<1x8x32xf32, #tpu.memory_space<vmem>>, vector<1x8x32xf32>
    %312 = vector.shape_cast %311 : vector<1x8x32xf32> to vector<8x32xf32>
    %313 = vector.shape_cast %310 : vector<8x32xf32> to vector<1x8x32xf32>
    tpu.vector_store %arg25[%c0_122, %c0_123, %c0_124], %313 {strides = array<i32>} : memref<1x8x32xf32, #tpu.memory_space<vmem>>, vector<1x8x32xf32>,
    return
  }
  func.func @transform_0(%arg0: i32) -> (i32, i32, i32) {
    %c0_i32 = arith.constant 0 : i32
    %c0_i32_0 = arith.constant 0 : i32
    %c0_i32_1 = arith.constant 0 : i32
    return %arg0, %c0_i32, %c0_i32_0 : i32, i32, i32
  }
  func.func @transform_1(%arg0: i32) -> (i32, i32, i32) {
    %c0_i32 = arith.constant 0 : i32
    %c0_i32_0 = arith.constant 0 : i32
    %c0_i32_1 = arith.constant 0 : i32
    return %arg0, %c0_i32, %c0_i32_0 : i32, i32, i32
  }
  func.func @transform_2(%arg0: i32) -> (i32, i32, i32) {
    %c0_i32 = arith.constant 0 : i32
    %c0_i32_0 = arith.constant 0 : i32
    %c0_i32_1 = arith.constant 0 : i32
    %c0_i32_2 = arith.constant 0 : i32
    return %c0_i32, %c0_i32_0, %c0_i32_1 : i32, i32, i32
  }
  func.func @transform_3(%arg0: i32) -> (i32, i32, i32) {
    %c0_i32 = arith.constant 0 : i32
    %c0_i32_0 = arith.constant 0 : i32
    %c0_i32_1 = arith.constant 0 : i32
    return %arg0, %c0_i32, %c0_i32_0 : i32, i32, i32
  }
  func.func @transform_4(%arg0: i32) -> (i32, i32) {
    %c0_i32 = arith.constant 0 : i32
    %c0_i32_0 = arith.constant 0 : i32
    %c0_i32_1 = arith.constant 0 : i32
    return %c0_i32, %c0_i32_0 : i32, i32
  }
  func.func @transform_5(%arg0: i32) -> (i32, i32) {
    %c0_i32 = arith.constant 0 : i32
    %c0_i32_0 = arith.constant 0 : i32
    %c0_i32_1 = arith.constant 0 : i32
    return %c0_i32, %c0_i32_0 : i32, i32
  }
  func.func @transform_6(%arg0: i32) -> (i32, i32) {
    %c0_i32 = arith.constant 0 : i32
    %c0_i32_0 = arith.constant 0 : i32
    %c0_i32_1 = arith.constant 0 : i32
    return %c0_i32, %c0_i32_0 : i32, i32
  }
  func.func @transform_7(%arg0: i32) -> (i32, i32) {
    %c0_i32 = arith.constant 0 : i32
    %c0_i32_0 = arith.constant 0 : i32
    %c0_i32_1 = arith.constant 0 : i32
    return %c0_i32, %c0_i32_0 : i32, i32
  }
  func.func @transform_8(%arg0: i32) -> (i32, i32) {
    %c0_i32 = arith.constant 0 : i32
    %c0_i32_0 = arith.constant 0 : i32
    %c0_i32_1 = arith.constant 0 : i32
    return %c0_i32, %c0_i32_0 : i32, i32
  }
  func.func @transform_9(%arg0: i32) -> (i32, i32) {
    %c0_i32 = arith.constant 0 : i32
    %c0_i32_0 = arith.constant 0 : i32
    %c0_i32_1 = arith.constant 0 : i32
    return %c0_i32, %c0_i32_0 : i32, i32
  }
  func.func @transform_10(%arg0: i32) -> (i32, i32) {
    %c0_i32 = arith.constant 0 : i32
    %c0_i32_0 = arith.constant 0 : i32
    %c0_i32_1 = arith.constant 0 : i32
    return %c0_i32, %c0_i32_0 : i32, i32
  }
  func.func @transform_11(%arg0: i32) -> (i32, i32) {
    %c0_i32 = arith.constant 0 : i32
    %c0_i32_0 = arith.constant 0 : i32
    %c0_i32_1 = arith.constant 0 : i32
    return %c0_i32, %c0_i32_0 : i32, i32
  }
  func.func @transform_12(%arg0: i32) -> (i32, i32) {
    %c0_i32 = arith.constant 0 : i32
    %c0_i32_0 = arith.constant 0 : i32
    %c0_i32_1 = arith.constant 0 : i32
    return %c0_i32, %c0_i32_0 : i32, i32
  }
  func.func @transform_13(%arg0: i32) -> (i32, i32) {
    %c0_i32 = arith.constant 0 : i32
    %c0_i32_0 = arith.constant 0 : i32
    %c0_i32_1 = arith.constant 0 : i32
    return %c0_i32, %c0_i32_0 : i32, i32
  }
  func.func @transform_14(%arg0: i32) -> (i32, i32) {
    %c0_i32 = arith.constant 0 : i32
    %c0_i32_0 = arith.constant 0 : i32
    %c0_i32_1 = arith.constant 0 : i32
    return %c0_i32, %c0_i32_0 : i32, i32
  }
  func.func @transform_15(%arg0: i32) -> (i32, i32) {
    %c0_i32 = arith.constant 0 : i32
    %c0_i32_0 = arith.constant 0 : i32
    %c0_i32_1 = arith.constant 0 : i32
    return %c0_i32, %c0_i32_0 : i32, i32
  }
  func.func @transform_16(%arg0: i32) -> (i32, i32) {
    %c0_i32 = arith.constant 0 : i32
    %c0_i32_0 = arith.constant 0 : i32
    %c0_i32_1 = arith.constant 0 : i32
    return %c0_i32, %c0_i32_0 : i32, i32
  }
  func.func @transform_17(%arg0: i32) -> (i32, i32) {
    %c0_i32 = arith.constant 0 : i32
    %c0_i32_0 = arith.constant 0 : i32
    %c0_i32_1 = arith.constant 0 : i32
    return %c0_i32, %c0_i32_0 : i32, i32
  }
  func.func @transform_18(%arg0: i32) -> (i32, i32) {
    %c0_i32 = arith.constant 0 : i32
    %c0_i32_0 = arith.constant 0 : i32
    %c0_i32_1 = arith.constant 0 : i32
    return %c0_i32, %c0_i32_0 : i32, i32
  }
  func.func @transform_19(%arg0: i32) -> (i32, i32) {
    %c0_i32 = arith.constant 0 : i32
    %c0_i32_0 = arith.constant 0 : i32
    %c0_i32_1 = arith.constant 0 : i32
    return %c0_i32, %c0_i32_0 : i32, i32
  }
  func.func @transform_20(%arg0: i32) -> (i32, i32) {
    %c0_i32 = arith.constant 0 : i32
    %c0_i32_0 = arith.constant 0 : i32
    %c0_i32_1 = arith.constant 0 : i32
    return %c0_i32, %c0_i32_0 : i32, i32
  }
  func.func @transform_21(%arg0: i32) -> (i32, i32) {
    %c0_i32 = arith.constant 0 : i32
    %c0_i32_0 = arith.constant 0 : i32
    %c0_i32_1 = arith.constant 0 : i32
    return %c0_i32, %c0_i32_0 : i32, i32
  }
  func.func @transform_22(%arg0: i32) -> (i32, i32) {
    %c0_i32 = arith.constant 0 : i32
    %c0_i32_0 = arith.constant 0 : i32
    %c0_i32_1 = arith.constant 0 : i32
    return %c0_i32, %c0_i32_0 : i32, i32
  }
  func.func @transform_23(%arg0: i32) -> (i32, i32) {
    %c0_i32 = arith.constant 0 : i32
    %c0_i32_0 = arith.constant 0 : i32
    %c0_i32_1 = arith.constant 0 : i32
    return %c0_i32, %c0_i32_0 : i32, i32
  }
  func.func @transform_24(%arg0: i32) -> (i32, i32, i32) {
    %c0_i32 = arith.constant 0 : i32
    %c0_i32_0 = arith.constant 0 : i32
    %c0_i32_1 = arith.constant 0 : i32
    return %arg0, %c0_i32, %c0_i32_0 : i32, i32, i32
  }
}

</mosaic_0001>

<bundles_post_ra>
// kernel: decoder_layer.1
= control target key start
LH: loop header
LB: loop body
LE: loop exit
PB: predicated region body
PF: predicated region fallthrough
CT: control target
= control target key end

     0   :  { %s5179_s0 = inlined_call_operand.vmem [shape: f32[2,8,32], index: 0, kind: input, shape index: {}]   ;;  %s5180_s1 = inlined_call_operand.hbm [shape: f32[2,8,32], index: 1, kind: input, shape index: {}]   ;;  %s5181_s2 = inlined_call_operand.vmem [shape: s32[1,8,8], index: 2, kind: input, shape index: {}]   ;;  %s5182_s3 = inlined_call_operand.vmem [shape: s32[2,1,8], index: 3, kind: input, shape index: {}]   ;;  %s5183_s4 = inlined_call_operand.vmem [shape: f32[32,96], index: 4, kind: input, shape index: {}]   ;;  %s5184_s5 = inlined_call_operand.hbm [shape: f32[1,96], index: 5, kind: input, shape index: {}]   ;;  %s5185_s6 = inlined_call_operand.vmem [shape: f32[32,32], index: 6, kind: input, shape index: {}]   ;;  %s5186_s7 = inlined_call_operand.hbm [shape: f32[1,32], index: 7, kind: input, shape index: {}]   ;;  %s5187_s8 = inlined_call_operand.vmem [shape: f32[32,32], index: 8, kind: input, shape index: {}]   ;;  %s5188_s9 = inlined_call_operand.hbm [shape: f32[1,32], index: 9, kind: input, shape index: {}]   ;;  %s5189_s10 = inlined_call_operand.vmem [shape: f32[32,64], index: 10, kind: input, shape index: {}]   ;;  %s5190_s11 = inlined_call_operand.hbm [shape: f32[1,64], index: 11, kind: input, shape index: {}]   ;;  %s5191_s12 = inlined_call_operand.hbm [shape: f32[32,32], index: 12, kind: input, shape index: {}]   ;;  %s5192_s13 = inlined_call_operand.hbm [shape: f32[1,32], index: 13, kind: input, shape index: {}]   ;;  %s5193_s14 = inlined_call_operand.hbm [shape: f32[32,64], index: 14, kind: input, shape index: {}]   ;;  %s5194_s15 = inlined_call_operand.hbm [shape: f32[1,64], index: 15, kind: input, shape index: {}]   ;;  %s5195_s16 = inlined_call_operand.vmem [shape: f32[64,32], index: 16, kind: input, shape index: {}]   ;;  %s5196_s17 = inlined_call_operand.hbm [shape: f32[1,32], index: 17, kind: input, shape index: {}]   ;;  %s5197_s18 = inlined_call_operand.hbm [shape: f32[1,32], index: 18, kind: input, shape index: {}]   ;;  %s5198_s19 = inlined_call_operand.hbm [shape: f32[1,32], index: 19, kind: input, shape index: {}]   ;;  %s5199_s20 = inlined_call_operand.hbm [shape: f32[1,32], index: 20, kind: input, shape index: {}]   ;;  %s5200_s21 = inlined_call_operand.hbm [shape: f32[1,32], index: 21, kind: input, shape index: {}]   ;;  %s5201_s22 = inlined_call_operand.hbm [shape: f32[1,32], index: 22, kind: input, shape index: {}]   ;;  %s5202_s23 = inlined_call_operand.hbm [shape: f32[1,32], index: 23, kind: input, shape index: {}]   ;;  %s5203_s24 = inlined_call_operand.hbm [shape: f32[2,8,32], index: 24, kind: output, shape index: {}]  }
   0x1   :  { %5231 = sst [smem:[#allocation39_spill]] %s5179_s0 }
   0x2   :  { %5232 = sst [smem:[#allocation40_spill]] %s5180_s1 }
   0x3   :  { %5233 = sst [smem:[#allocation41_spill]] %s5181_s2 }
   0x4   :  { %5234 = sst [smem:[#allocation42_spill]] %s5182_s3 }
   0x5   :  { %5235 = sst [smem:[#allocation43_spill]] %s5183_s4 }
   0x6   :  { %5236 = sst [smem:[#allocation44_spill]] %s5184_s5 }
   0x7   :  { %5237 = sst [smem:[#allocation45_spill]] %s5185_s6 }
   0x8   :  { %5238 = sst [smem:[#allocation46_spill]] %s5186_s7 }
   0x9   :  { %5239 = sst [smem:[#allocation47_spill]] %s5187_s8 }
   0xa   :  { %5240 = sst [smem:[#allocation48_spill]] %s5188_s9 }
   0xb   :  { %5241 = sst [smem:[#allocation49_spill]] %s5189_s10 }
   0xc   :  { %5242 = sst [smem:[#allocation50_spill]] %s5190_s11 }
   0xd   :  { %5243 = sst [smem:[#allocation51_spill]] %s5191_s12 }
   0xe   :  { %5244 = sst [smem:[#allocation52_spill]] %s5192_s13 }
   0xf   :  { %5245 = sst [smem:[#allocation53_spill]] %s5193_s14 }
  0x10   :  { %5246 = sst [smem:[#allocation54_spill]] %s5194_s15 }
  0x11   :  { %5247 = sst [smem:[#allocation55_spill]] %s5195_s16 }
  0x12   :  { %5248 = sst [smem:[#allocation56_spill]] %s5196_s17 }
  0x13   :  { %5249 = sst [smem:[#allocation57_spill]] %s5197_s18 }
  0x14   :  { %5250 = sst [smem:[#allocation58_spill]] %s5203_s24 }
  0x15   :  { %29 = vsyncpa [#allocation3], 0 }
  0x16   :  { %31 = vsyncpa [#allocation3 + $0x1], 0 }
  0x17   :  { %32 = vsyncpa [#allocation6], 0 }
  0x18   :  { %33 = vsyncpa [#allocation9], 0 }
  0x19   :  { %34 = vsyncpa [#allocation12], 0 }
  0x1a   :  { %35 = vsyncpa [#allocation15], 0 }
  0x1b   :  { %36 = vsyncpa [#allocation18], 0 }
  0x1c   :  { %37 = vsyncpa [#allocation21], 0 }
  0x1d   :  { %38 = vsyncpa [#allocation24], 0 }
  0x1e   :  { %39 = vsyncpa [#allocation27], 0 }
  0x1f   :  { %40 = vsyncpa [#allocation4], 0 }
  0x20   :  { %42 = vsyncpa [#allocation4 + $0x1], 0  ;;  %s4571_s5 = smov 0   ;;  %s4573_s26 = smov 0  }
  0x21   :  { %s4575_s27 = smov 0   ;;  %s4577_s28 = smov 0  }
  0x22 LB: > { %s4410_s6 = smov [#allocation5]   ;;  %s4592_s29 = sadd.s32 4294967295, %s4408_s28   ;;  %s4408_s28 = sphi %s4577_s28, %s5313_s28   ;;  %s4404_s27 = sphi %s4575_s27, %s5312_s27   ;;  %s4400_s26 = sphi %s4573_s26, %s5311_s26   ;;  %s4396_s5 = sphi %s4571_s5, %s5310_s5  }
  0x23   : > { %s617_s2 = sshll.u32 %s4410_s6, 4  ;;  %p3312_p0 = scmp.ge.s32.totalorder %s4408_s28, 1  ;;  %s618_s2 = int_to_ptr.vmem [resolvable:$true] %s617_s2 }
  0x24   : > { %p5211_p1 = scmp.eq.s32.totalorder %s4592_s29, 0  ;;  %p598_p2 = scmp.lt.s32.totalorder %s4408_s28, 3 }
  0x25   : > { %s4411_s7 = smov [#allocation8]   ;;  %s4412_s3 = smov [#allocation11]  }
  0x26   : > { %p4597_p3 = pnand %p3312_p0, %p598_p2  ;;  %s645_s30 = sshll.u32 %s4411_s7, 4  ;;  %s646_s30 = int_to_ptr.vmem [resolvable:$true] %s645_s30 }
  0x27   : > { %s669_s25 = sshll.u32 %s4412_s3, 4  ;;  %s3905_s1 = scalar_lea.vmem %s618_s2, 16  ;;  %s4610_s25 = int_to_ptr.vmem [resolvable:$true] %s669_s25 }
  0x28   : > { %s5251_s0 = scalar_select %p4597_p3, 1, 0 }
  0x29   : > { %p3698_p5 = pneg %p4597_p3  ;;  %p3906_p8 = scmp.ne.s32.totalorder %s618_s2, %s3905_s1 }
  0x2a   : > { %s3912_s6 = scalar_lea.vmem %s618_s2, 32  ;;  %p3913_p11 = scmp.lt.s32.totalorder %s618_s2, %s618_s2 }
  0x2b   : > { %p4606_p6 = pnand %p3698_p5, %p5211_p1  ;;  %p3914_p12 = scmp.lt.s32.totalorder %s3912_s6, %s3905_s1 }
  0x2d   : > { %p4614_p7 = pneg %p4606_p6  ;;  %p3915_p13 = por %p3914_p12, %p3913_p11 }
  0x2f   : > { %p3908_p9 = pnand %p3906_p8, %p4614_p7 }
  0x31   : > { %p3909_p10 = pneg %p3908_p9 }
  0x33   : > { %p3916_p0 = pnand %p3915_p13, %p3909_p10 }
  0x35   : > { %3919 = shalt.err (!%p3916_p0)
}
  0x36   : > { %s5254_s24 = sld [smem:[#allocation44_spill]]  ;;  %s3931_s16 = scalar_lea.vmem %s646_s30, 16 }
  0x37   : > { %p3932_p2 = scmp.ne.s32.totalorder %s646_s30, %s3931_s16  ;;  %s3938_s10 = scalar_lea.vmem %s646_s30, 32 }
  0x38   : > { %p3939_p8 = scmp.lt.s32.totalorder %s646_s30, %s646_s30  ;;  %p3940_p9 = scmp.lt.s32.totalorder %s3938_s10, %s3931_s16 }
  0x39   : > { %p3934_p5 = pnand %p3932_p2, %p4614_p7 }
  0x3a   : > { %p3941_p1 = por %p3940_p9, %p3939_p8 }
  0x3b   : > { %p3935_p4 = pneg %p3934_p5 }
  0x3c   : > { %3701 = dma.hbm_to_vmem [thread:$0]  (!%p4606_p6), %s5254_s24, 16, %s618_s2, [#allocation6]  }
  0x3d   : > { %p3942_p3 = pnand %p3941_p1, %p3935_p4 }
  0x3f   : > { %3945 = shalt.err (!%p3942_p3)
}
  0x40   : > { %s5255_s9 = sld [smem:[#allocation48_spill]]  ;;  %s3957_s24 = scalar_lea.vmem %s4610_s25, 512 }
  0x41   : > { %p3958_p10 = scmp.ne.s32.totalorder %s4610_s25, %s3957_s24  ;;  %p3965_p13 = scmp.lt.s32.totalorder %s4610_s25, %s4610_s25 }
  0x42   : > { %p3966_p0 = scmp.lt.s32.totalorder %s3957_s24, %s3957_s24 }
  0x43   : > { %p3960_p11 = pnand %p3958_p10, %p4614_p7 }
  0x44   : > { %p3967_p1 = por %p3966_p0, %p3965_p13 }
  0x45   : > { %p3961_p12 = pneg %p3960_p11 }
  0x46   : > { %3707 = dma.hbm_to_vmem [thread:$0]  (!%p4606_p6), %s5255_s9, 16, %s646_s30, [#allocation9]  }
  0x47   : > { %p3968_p3 = pnand %p3967_p1, %p3961_p12 }
  0x49   : > { %3971 = shalt.err (!%p3968_p3)
}
  0x4a   : > { %s4413_s10 = smov 128   ;;  %s4414_s16 = smov 8  }
  0x4b   : > { %s5256_s12 = sld [smem:[#allocation51_spill]]  ;;  %s4415_s30 = smov [#allocation14]  }
  0x4c   : > { %s693_s3 = sshll.u32 %s4415_s30, 4  ;;  %s4416_s1 = smov [#allocation17]   ;;  %s694_s3 = int_to_ptr.vmem [resolvable:$true] %s693_s3 }
  0x4d   : > { %s721_s6 = sshll.u32 %s4416_s1, 4  ;;  %s3983_s9 = scalar_lea.vmem %s694_s3, 512  ;;  %s722_s6 = int_to_ptr.vmem [resolvable:$true] %s721_s6 }
  0x4e   : > { %p3984_p4 = scmp.ne.s32.totalorder %s694_s3, %s3983_s9  ;;  %p3991_p8 = scmp.lt.s32.totalorder %s694_s3, %s694_s3 }
  0x4f   : > { %p3992_p9 = scmp.lt.s32.totalorder %s3983_s9, %s3983_s9 }
  0x50   : > { %p3986_p2 = pnand %p3984_p4, %p4614_p7 }
  0x51   : > { %3713 = dma.hbm_to_vmem [thread:$0]  (!%p4606_p6), %s5256_s12, 512, %s4610_s25, [#allocation12], %s4413_s10, %s4413_s10, %s4414_s16  }
  0x52   : > { %p3987_p5 = pneg %p3986_p2  ;;  %p3993_p10 = por %p3992_p9, %p3991_p8 }
  0x54   : > { %p3994_p11 = pnand %p3993_p10, %p3987_p5 }
  0x56   : > { %3997 = shalt.err (!%p3994_p11)
}
  0x57   : > { %s5257_s14 = sld [smem:[#allocation53_spill]]  ;;  %s4009_s25 = scalar_lea.vmem %s722_s6, 16 }
  0x58   : > { %p4010_p12 = scmp.ne.s32.totalorder %s722_s6, %s4009_s25  ;;  %s4016_s7 = scalar_lea.vmem %s722_s6, 32 }
  0x59   : > { %p4017_p1 = scmp.lt.s32.totalorder %s722_s6, %s722_s6  ;;  %p4018_p3 = scmp.lt.s32.totalorder %s4016_s7, %s4009_s25 }
  0x5a   : > { %p4012_p13 = pnand %p4010_p12, %p4614_p7 }
  0x5b   : > { %p4019_p4 = por %p4018_p3, %p4017_p1 }
  0x5c   : > { %p4013_p0 = pneg %p4012_p13 }
  0x5d   : > { %3719 = dma.hbm_to_vmem [thread:$0]  (!%p4606_p6), %s5257_s14, 512, %s694_s3, [#allocation15], %s4413_s10, %s4413_s10, %s4414_s16  }
  0x5e   : > { %p4020_p2 = pnand %p4019_p4, %p4013_p0 }
  0x60   : > { %4023 = shalt.err (!%p4020_p2)
}
  0x61   : > { %s5258_s17 = sld [smem:[#allocation56_spill]]  ;;  %s4417_s10 = smov [#allocation20]  }
  0x62   : > { %s743_s16 = sshll.u32 %s4417_s10, 4  ;;  %s4418_s3 = smov [#allocation23]   ;;  %s744_s16 = int_to_ptr.vmem [resolvable:$true] %s743_s16 }
  0x63   : > { %s765_s1 = sshll.u32 %s4418_s3, 4  ;;  %s4035_s24 = scalar_lea.vmem %s744_s16, 16  ;;  %s766_s1 = int_to_ptr.vmem [resolvable:$true] %s765_s1 }
  0x64   : > { %p4036_p5 = scmp.ne.s32.totalorder %s744_s16, %s4035_s24  ;;  %s4042_s2 = scalar_lea.vmem %s744_s16, 32 }
  0x65   : > { %p4043_p10 = scmp.lt.s32.totalorder %s744_s16, %s744_s16  ;;  %p4044_p11 = scmp.lt.s32.totalorder %s4042_s2, %s4035_s24 }
  0x66   : > { %p4038_p8 = pnand %p4036_p5, %p4614_p7 }
  0x67   : > { %3725 = dma.hbm_to_vmem [thread:$0]  (!%p4606_p6), %s5258_s17, 16, %s722_s6, [#allocation18]  }
  0x68   : > { %p4039_p9 = pneg %p4038_p8  ;;  %p4045_p12 = por %p4044_p11, %p4043_p10 }
  0x6a   : > { %p4046_p13 = pnand %p4045_p12, %p4039_p9 }
  0x6c   : > { %4049 = shalt.err (!%p4046_p13)
}
  0x6d   : > { %3731 = dma.hbm_to_vmem [thread:$0]  (!%p4606_p6), %s5198_s19, 16, %s744_s16, [#allocation21]  }
  0x6e   : > { %s4061_s7 = scalar_lea.vmem %s766_s1, 16  ;;  %s4068_s9 = scalar_lea.vmem %s766_s1, 32 }
  0x6f   : > { %p4062_p0 = scmp.ne.s32.totalorder %s766_s1, %s4061_s7  ;;  %p4069_p4 = scmp.lt.s32.totalorder %s766_s1, %s766_s1 }
  0x70   : > { %p4070_p2 = scmp.lt.s32.totalorder %s4068_s9, %s4061_s7 }
  0x71   : > { %p4064_p1 = pnand %p4062_p0, %p4614_p7 }
  0x72   : > { %p4071_p5 = por %p4070_p2, %p4069_p4 }
  0x73   : > { %p4065_p3 = pneg %p4064_p1 }
  0x75   : > { %p4072_p8 = pnand %p4071_p5, %p4065_p3 }
  0x77   : > { %4075 = shalt.err (!%p4072_p8)
}
  0x78   : > { %3737 = dma.hbm_to_vmem [thread:$0]  (!%p4606_p6), %s5200_s21, 16, %s766_s1, [#allocation24]  }
  0x79   : > { %s4419_s16 = smov [#allocation7]   ;;  %s4420_s24 = smov [#allocation10]  }
  0x7a   : > { %s631_s3 = sshll.u32 %s4419_s16, 4  ;;  %s659_s2 = sshll.u32 %s4420_s24, 4  ;;  %s632_s3 = int_to_ptr.vmem [resolvable:$true] %s631_s3  ;;  %s660_s2 = int_to_ptr.vmem [resolvable:$true] %s659_s2 }
  0x7b   : > { %s4087_s25 = scalar_lea.vmem %s632_s3, 16  ;;  %s4094_s6 = scalar_lea.vmem %s632_s3, 32 }
  0x7c   : > { %p4088_p9 = scmp.ne.s32.totalorder %s632_s3, %s4087_s25  ;;  %p4095_p12 = scmp.lt.s32.totalorder %s632_s3, %s632_s3 }
  0x7d   : > { %p4096_p13 = scmp.lt.s32.totalorder %s4094_s6, %s4087_s25 }
  0x7e   : > { %p4090_p10 = pnand %p4088_p9, %p4614_p7 }
  0x7f   : > { %p4097_p0 = por %p4096_p13, %p4095_p12 }
  0x80   : > { %p4091_p11 = pneg %p4090_p10 }
  0x82   : > { %p4098_p1 = pnand %p4097_p0, %p4091_p11 }
  0x84   : > { %4101 = shalt.err (!%p4098_p1)
}
  0x85   : > { %s5259_s9 = sld [smem:[#allocation46_spill]]  ;;  %s4113_s30 = scalar_lea.vmem %s660_s2, 16 }
  0x86   : > { %p4114_p3 = scmp.ne.s32.totalorder %s660_s2, %s4113_s30  ;;  %s4120_s10 = scalar_lea.vmem %s660_s2, 32 }
  0x87   : > { %p4121_p5 = scmp.lt.s32.totalorder %s660_s2, %s660_s2  ;;  %p4122_p8 = scmp.lt.s32.totalorder %s4120_s10, %s4113_s30 }
  0x88   : > { %p4116_p4 = pnand %p4114_p3, %p4614_p7 }
  0x89   : > { %p4123_p9 = por %p4122_p8, %p4121_p5 }
  0x8a   : > { %p4117_p2 = pneg %p4116_p4 }
  0x8b   : > { %3704 = dma.hbm_to_vmem [thread:$0]  (!%p4606_p6), %s5259_s9, 16, %s632_s3, [#allocation6]  }
  0x8c   : > { %p4124_p10 = pnand %p4123_p9, %p4117_p2 }
  0x8e   : > { %4127 = shalt.err (!%p4124_p10)
}
  0x8f   : > { %s5260_s11 = sld [smem:[#allocation50_spill]]  ;;  %s4421_s3 = smov [#allocation13]  }
  0x90   : > { %s683_s25 = sshll.u32 %s4421_s3, 4  ;;  %s4422_s6 = smov [#allocation16]   ;;  %s684_s25 = int_to_ptr.vmem [resolvable:$true] %s683_s25 }
  0x91   : > { %s707_s7 = sshll.u32 %s4422_s6, 4  ;;  %s4139_s1 = scalar_lea.vmem %s684_s25, 16  ;;  %s708_s7 = int_to_ptr.vmem [resolvable:$true] %s707_s7 }
  0x92   : > { %p4140_p11 = scmp.ne.s32.totalorder %s684_s25, %s4139_s1  ;;  %s4146_s9 = scalar_lea.vmem %s684_s25, 32 }
  0x93   : > { %p4147_p0 = scmp.lt.s32.totalorder %s684_s25, %s684_s25  ;;  %p4148_p1 = scmp.lt.s32.totalorder %s4146_s9, %s4139_s1 }
  0x94   : > { %p4142_p12 = pnand %p4140_p11, %p4614_p7 }
  0x95   : > { %3710 = dma.hbm_to_vmem [thread:$0]  (!%p4606_p6), %s5260_s11, 16, %s660_s2, [#allocation9]  }
  0x96   : > { %p4143_p13 = pneg %p4142_p12  ;;  %p4149_p3 = por %p4148_p1, %p4147_p0 }
  0x98   : > { %p4150_p4 = pnand %p4149_p3, %p4143_p13 }
  0x9a   : > { %4153 = shalt.err (!%p4150_p4)
}
  0x9b   : > { %s5261_s13 = sld [smem:[#allocation52_spill]]  ;;  %s4165_s10 = scalar_lea.vmem %s708_s7, 16 }
  0x9c   : > { %p4166_p2 = scmp.ne.s32.totalorder %s708_s7, %s4165_s10  ;;  %s4172_s16 = scalar_lea.vmem %s708_s7, 32 }
  0x9d   : > { %p4173_p9 = scmp.lt.s32.totalorder %s708_s7, %s708_s7  ;;  %p4174_p10 = scmp.lt.s32.totalorder %s4172_s16, %s4165_s10 }
  0x9e   : > { %p4168_p5 = pnand %p4166_p2, %p4614_p7 }
  0x9f   : > { %p4175_p11 = por %p4174_p10, %p4173_p9 }
  0xa0   : > { %p4169_p8 = pneg %p4168_p5 }
  0xa1   : > { %3716 = dma.hbm_to_vmem [thread:$0]  (!%p4606_p6), %s5261_s13, 16, %s684_s25, [#allocation12]  }
  0xa2   : > { %p4176_p12 = pnand %p4175_p11, %p4169_p8 }
  0xa4   : > { %4179 = shalt.err (!%p4176_p12)
}
  0xa5   : > { %s5262_s15 = sld [smem:[#allocation54_spill]]  ;;  %s4423_s25 = smov [#allocation19]  }
  0xa6   : > { %s732_s6 = sshll.u32 %s4423_s25, 4  ;;  %s4424_s1 = smov [#allocation22]   ;;  %s733_s6 = int_to_ptr.vmem [resolvable:$true] %s732_s6 }
  0xa7   : > { %s754_s9 = sshll.u32 %s4424_s1, 4  ;;  %s4191_s30 = scalar_lea.vmem %s733_s6, 16  ;;  %s755_s9 = int_to_ptr.vmem [resolvable:$true] %s754_s9 }
  0xa8   : > { %p4192_p13 = scmp.ne.s32.totalorder %s733_s6, %s4191_s30  ;;  %s4198_s2 = scalar_lea.vmem %s733_s6, 32 }
  0xa9   : > { %p4199_p3 = scmp.lt.s32.totalorder %s733_s6, %s733_s6  ;;  %p4200_p4 = scmp.lt.s32.totalorder %s4198_s2, %s4191_s30 }
  0xaa   : > { %p4194_p0 = pnand %p4192_p13, %p4614_p7 }
  0xab   : > { %3722 = dma.hbm_to_vmem [thread:$0]  (!%p4606_p6), %s5262_s15, 16, %s708_s7, [#allocation15]  }
  0xac   : > { %p4195_p1 = pneg %p4194_p0  ;;  %p4201_p2 = por %p4200_p4, %p4199_p3 }
  0xae   : > { %p4202_p5 = pnand %p4201_p2, %p4195_p1 }
  0xb0   : > { %4205 = shalt.err (!%p4202_p5)
}
  0xb1   : > { %s5263_s18 = sld [smem:[#allocation57_spill]]  ;;  %s4217_s16 = scalar_lea.vmem %s755_s9, 16 }
  0xb2   : > { %p4218_p8 = scmp.ne.s32.totalorder %s755_s9, %s4217_s16  ;;  %s4224_s24 = scalar_lea.vmem %s755_s9, 32 }
  0xb3   : > { %p4225_p11 = scmp.lt.s32.totalorder %s755_s9, %s755_s9  ;;  %p4226_p12 = scmp.lt.s32.totalorder %s4224_s24, %s4217_s16 }
  0xb4   : > { %p4220_p9 = pnand %p4218_p8, %p4614_p7 }
  0xb5   : > { %p4227_p13 = por %p4226_p12, %p4225_p11 }
  0xb6   : > { %p4221_p10 = pneg %p4220_p9 }
  0xb7   : > { %3728 = dma.hbm_to_vmem [thread:$0]  (!%p4606_p6), %s5263_s18, 16, %s733_s6, [#allocation18]  }
  0xb8   : > { %p4228_p0 = pnand %p4227_p13, %p4221_p10 }
  0xba   : > { %4231 = shalt.err (!%p4228_p0)
}
  0xbb   : > { %3734 = dma.hbm_to_vmem [thread:$0]  (!%p4606_p6), %s5199_s20, 16, %s755_s9, [#allocation21]  }
  0xbc   : > { %s4425_s6 = smov [#allocation25]   ;;  %s4426_s30 = smov [#allocation26]  }
  0xbd   : > { %s776_s1 = sshll.u32 %s4425_s6, 4  ;;  %s787_s2 = sshll.u32 %s4426_s30, 4  ;;  %s777_s1 = int_to_ptr.vmem [resolvable:$true] %s776_s1  ;;  %s788_s2 = int_to_ptr.vmem [resolvable:$true] %s787_s2 }
  0xbe   : > { %s4243_s10 = scalar_lea.vmem %s777_s1, 16  ;;  %s4250_s7 = scalar_lea.vmem %s777_s1, 32 }
  0xbf   : > { %p4244_p1 = scmp.ne.s32.totalorder %s777_s1, %s4243_s10  ;;  %p4251_p2 = scmp.lt.s32.totalorder %s777_s1, %s777_s1 }
  0xc0   : > { %p4252_p5 = scmp.lt.s32.totalorder %s4250_s7, %s4243_s10 }
  0xc1   : > { %p4246_p3 = pnand %p4244_p1, %p4614_p7 }
  0xc2   : > { %p4253_p8 = por %p4252_p5, %p4251_p2 }
  0xc3   : > { %p4247_p4 = pneg %p4246_p3 }
  0xc5   : > { %p4254_p9 = pnand %p4253_p8, %p4247_p4 }
  0xc7   : > { %4257 = shalt.err (!%p4254_p9)
}
  0xc8   : > { %3740 = dma.hbm_to_vmem [thread:$0]  (!%p4606_p6), %s5201_s22, 16, %s777_s1, [#allocation24]  }
  0xc9   : > { %s4269_s24 = scalar_lea.vmem %s788_s2, 16  ;;  %s4276_s3 = scalar_lea.vmem %s788_s2, 32 }
  0xca   : > { %p4270_p10 = scmp.ne.s32.totalorder %s788_s2, %s4269_s24  ;;  %p4277_p13 = scmp.lt.s32.totalorder %s788_s2, %s788_s2 }
  0xcb   : > { %p4278_p0 = scmp.lt.s32.totalorder %s4276_s3, %s4269_s24 }
  0xcc   : > { %p4272_p11 = pnand %p4270_p10, %p4614_p7 }
  0xcd   : > { %p4279_p1 = por %p4278_p0, %p4277_p13 }
  0xce   : > { %p4273_p12 = pneg %p4272_p11 }
  0xd0   : > { %p4280_p3 = pnand %p4279_p1, %p4273_p12 }
  0xd2   : > { %4283 = shalt.err (!%p4280_p3)
}
  0xd3   : > { %3743 = dma.hbm_to_vmem [thread:$0]  (!%p4606_p6), %s5202_s23, 16, %s788_s2, [#allocation27]  }
  0xd4   : > { %s3311_s4 = sadd.s32 4294967294, %s4408_s28   ;;  %s4730_s8 = sadd.s32 1, %s4408_s28  }
  0xd5   : > { %s81_s1 = sadd.s32 1, %s4404_s27  ;;  %s78_s30 = ssub.s32 %s4408_s28, %s4730_s8 }
  0xd6   : > { %p88_p7 = scmp.ne.s32.totalorder %s4404_s27, %s4400_s26  ;;  %p79_p4 = scmp.eq.s32.totalorder %s78_s30, 0 }
  0xd7   : > { %p89_p2 = scmp.eq.s32.totalorder %s4408_s28, 0  ;;  %p94_p5 = scmp.ne.s32.totalorder %s4400_s26, %s4396_s5 }
  0xd8   : > { %p585_p8 = scmp.eq.s32.totalorder %s4592_s29, 1  ;;  %p5264_p10 = scmp.eq.s32.totalorder %s4592_s29, 0 }
  0xd9   : > { %s4742_s10 = scalar_select %p79_p4, %s4404_s27, %s81_s1  }
  0xda   : > { %p90_p9 = por %p89_p2, %p88_p7  ;;  %p4746_p11 = por %p5264_p10, %p94_p5 }
  0xdb   : > { %p4750_p6 = por %p585_p8, %p88_p7  ;;  %p591_p12 = scmp.eq.s32.totalorder %s3311_s4, 1 }
  0xdc   : > { %s5265_s7 = scalar_select %p4746_p11, 1, 0 }
  0xdd   : > { %s5266_s2 = scalar_select %p4750_p6, 1, 0 }
  0xde   : > { %p3767_p13 = scmp.lt.s32.totalorder %s4408_s28, 2  ;;  %s805_s16 = sand.u32 1, %s4404_s27  }
  0xdf   : > { %p4756_p0 = por %p591_p12, %p94_p5  ;;  %s3329_s24 = sshll.u32 %s805_s16, 3 }
  0xe0   : > { %s3330_s3 = sshll.u32 %s4408_s28, 7  ;;  %s5268_s1 = sld [smem:[#allocation40_spill]] }
  0xe1   : > { %s5267_s9 = scalar_select %p4756_p0, 1, 0 }
  0xe2   : > { %s809_s11 = scalar_lea.vmem [#allocation2], %s3329_s24  ;;  %p4766_p1 = pnand %p3767_p13, %p90_p9 }
  0xe3   : > { %s816_s12 = sshll.u32 %s809_s11, 4  ;;  %s806_s13 = scalar_lea.sflag [#allocation3], %s805_s16  ;;  %s817_s12 = int_to_ptr.vmem [resolvable:$true] %s816_s12 }
  0xe4   : > { %p4286_p7 = pneg %p4766_p1 }
  0xe6   : > { %s4764_s30 = scalar_lea.hbm %s5268_s1, %s3330_s3  ;;  %s4289_s6 = scalar_lea.hbm %s5268_s1, 256 }
  0xe7   : > { %s4284_s14 = scalar_lea.hbm %s4764_s30, 128  ;;  %p4290_p5 = scmp.lt.s32.totalorder %s4764_s30, %s5268_s1 }
  0xe8   : > { %p4285_p3 = scmp.ne.s32.totalorder %s4764_s30, %s4284_s14  ;;  %p4291_p8 = scmp.lt.s32.totalorder %s4289_s6, %s4284_s14 }
  0xea   : > { %p4287_p4 = pnand %p4286_p7, %p4285_p3  ;;  %p4292_p9 = por %p4291_p8, %p4290_p5 }
  0xec   : > { %p4288_p2 = pneg %p4287_p4 }
  0xee   : > { %p4293_p10 = pnand %p4292_p9, %p4288_p2 }
  0xf0   : > { %4296 = shalt.err (!%p4293_p10)
}
  0xf1   : > { %s4297_s11 = scalar_lea.vmem %s817_s12, 128  ;;  %s4427_s16 = smov [#allocation2]  }
  0xf2   : > { %p4298_p12 = scmp.ne.s32.totalorder %s817_s12, %s4297_s11  ;;  %s4302_s17 = sshll.u32 %s4427_s16, 4  ;;  %s4303_s17 = int_to_ptr.vmem [resolvable:$false] %s4302_s17 }
  0xf3   : > { %s4304_s18 = scalar_lea.vmem %s4303_s17, 256  ;;  %p4305_p3 = scmp.lt.s32.totalorder %s817_s12, %s4303_s17 }
  0xf4   : > { %p4300_p13 = pnand %p4298_p12, %p4286_p7  ;;  %p4306_p4 = scmp.lt.s32.totalorder %s4304_s18, %s4297_s11 }
  0xf6   : > { %p4301_p0 = pneg %p4300_p13  ;;  %p4307_p6 = por %p4306_p4, %p4305_p3 }
  0xf8   : > { %p4308_p11 = pnand %p4307_p6, %p4301_p0 }
  0xfa   : > { %4311 = shalt.err (!%p4308_p11)
}
  0xfb   : > { %3747 = dma.hbm_to_vmem [thread:$0]  (!%p4766_p1), %s4764_s30, 128, %s817_s12, %s806_s13  }
  0xfc   : > { %p5270_p2 = scmp.ne.s32.totalorder %s5251_s0, 0 }
  0xfd   : > { %s4787_s14 = sand.u32 (!%p5270_p2), 1, %s4400_s26   ;;  %p5271_p11 = scmp.ne.s32.totalorder (!%p5270_p2), %s5265_s7, 0 }
  0xfe   : > { %831 = sbr.rel (%p5270_p2) target bundleno = 4357 (0x1105), region = 116  ;;  %s5215_s15 = sshll.u32 (!%p5270_p2), %s4787_s14, 3 }
  0xff   : > { %s834_s17 = scalar_lea.sflag (!%p5270_p2), [#allocation3], %s4787_s14  ;;  %s4793_s18 = scalar_lea.vmem (!%p5270_p2), [#allocation2], %s5215_s15 }
 0x103   : > { %4355 = dma.done.wait (%p5271_p11), %s834_s17, 128  }
 0x104   : > { %4357 = vsyncadd (%p5271_p11), %s834_s17, 4294967168  ;;  %p5272_p6 = scmp.eq.s32.totalorder %s4592_s29, 0 }
 0x106   : > { %4359 = dma.done.wait (%p5272_p6), [#allocation6], 32   ;;  %p5273_p0 = pmov %p5272_p6 }
 0x108   : > { %4361 = vsyncadd (%p5273_p0), [#allocation6], 4294967264  ;;  %p5274_p1 = pmov %p5273_p0 }
 0x109   : > { %p5275_p7 = pmov %p5273_p0 }
 0x10a   : > { %4363 = dma.done.wait (%p5274_p1), [#allocation9], 32  }
 0x10b   : > { %4365 = vsyncadd (%p5275_p7), [#allocation9], 4294967264  ;;  %p5276_p5 = pmov %p5273_p0 }
 0x10c   : > { %p5277_p8 = pmov %p5273_p0 }
 0x10d   : > { %4367 = dma.done.wait (%p5276_p5), [#allocation12], 528  }
 0x10e   : > { %4369 = vsyncadd (%p5277_p8), [#allocation12], 4294966768  ;;  %p5278_p9 = pmov %p5273_p0 }
 0x10f   : > { %p5279_p10 = pmov %p5273_p0 }
 0x110   : > { %4371 = dma.done.wait (%p5278_p9), [#allocation15], 528  }
 0x111   : > { %4373 = vsyncadd (%p5279_p10), [#allocation15], 4294966768  ;;  %p5280_p12 = pmov %p5273_p0 }
 0x112   : > { %p5281_p13 = pmov %p5273_p0 }
 0x113   : > { %4375 = dma.done.wait (%p5280_p12), [#allocation18], 32  }
 0x114   : > { %4377 = vsyncadd (%p5281_p13), [#allocation18], 4294967264  ;;  %p5282_p3 = pmov %p5273_p0 }
 0x115   : > { %p5283_p4 = pmov %p5273_p0 }
 0x116   : > { %4379 = dma.done.wait (%p5282_p3), [#allocation21], 32  }
 0x117   : > { %4381 = vsyncadd (%p5283_p4), [#allocation21], 4294967264  ;;  %p5284_p2 = pmov %p5273_p0 }
 0x118   : > { %p5285_p11 = pmov %p5273_p0 }
 0x119   : > { %4383 = dma.done.wait (%p5284_p2), [#allocation24], 32  }
 0x11a   : > { %4385 = vsyncadd (%p5285_p11), [#allocation24], 4294967264  ;;  %p5286_p6 = pmov %p5273_p0 }
 0x11c   : > { %4387 = dma.done.wait (%p5286_p6), [#allocation27], 16  }
 0x11d   : > { %4389 = vsyncadd (%p5273_p0), [#allocation27], 4294967280  ;;  %p969_p1 = scmp.lt.s32.totalorder %s4592_s29, 1  ;;  %s5287_s30 = sld [smem:[#allocation39_spill]]  ;;  %vm980_vm0 = vcmask 261120   ;;  %v4428_v8 = vmov 0.0  }
 0x11e   : > { %s5288_s6 = sld [smem:[#allocation43_spill]]  ;;  %3469 = vmatprep.subr.mxu1 %v4428_v8  ;;  %vm4429_vm1 = vmmov 0   ;;  %3490 = vmatprep.subr.mxu0 %v4428_v8  ;;  %v3350_v21 = vld [vmem:[#allocation19] ss:$0 sm:$0xff]  ;;  %v3351_v23 = vld [vmem:[#allocation20] ss:$0 sm:$0xff] }
 0x11f   : > { %s4833_s12 = scalar_select %p969_p1, %s4592_s29, 1  ;;  %3477 = vmatprep.mubr.msk.f32.mxu1 %vm4429_vm1, %v4428_v8  ;;  %3492 = vmatprep.mubr.msk.f32.mxu0 %vm4429_vm1, %v4428_v8  ;;  %v3352_v26 = vld [vmem:[#allocation5] ss:$0 sm:$0xff]  ;;  %vm1107_vm4 = vcmask 64512   ;;  %vm1785_vm6 = vcmask 130048   ;;  %vm1787_vm7 = vcmask 195584  }
 0x120   : > { %s5227_s7 = smov 120   ;;  %s5217_s3 = smov 80   ;;  %vm2987_vm14 = vcmask 523264  }
 0x121   : > { %s3349_s13 = sshll.u32 %s4833_s12, 3  ;;  %s5225_s25 = smov 112  }
 0x122   : > { %s5216_s24 = smov 72   ;;  %s5223_s11 = smov 104  }
 0x123   : > { %s972_s4 = scalar_lea.vmem %s5287_s30, %s3349_s13  ;;  %s5221_s30 = smov 96  }
 0x124   : > { %v4839_v0 = vld [vmem:[%s972_s4] sm:$0xff]  ;;  %v1022_v7 = vld [vmem:[%s5288_s6 + $0x18] sm:$0xff]  ;;  %v1021_v9 = vld [vmem:[%s5288_s6 + $0x10] sm:$0xff]  ;;  %s5222_s4 = smov 88   ;;  %s5289_s13 = sld [smem:[#allocation41_spill]] }
 0x125   : > { %v981_v1 = vsel %vm980_vm0, %v4839_v0, 0.0  ;;  %3470 = vmatpush3.msra.mxu1 %v1022_v7  ;;  %v1020_v10 = vld [vmem:[%s5288_s6 + $0x8] sm:$0xff]  ;;  %v1019_v11 = vld [vmem:[%s5288_s6] sm:$0xff]  ;;  %s4437_s0 = smov 64   ;;  %s4438_s16 = smov 48  }
 0x126   : > { %982 = vadd.xlane.f32.xlu0 %v981_v1  ;;  %3471 = vmatprep.subr.mxu1 %v4428_v8  ;;  %s4439_s17 = smov 40   ;;  %s5220_s15 = smov 8  }
 0x127   : > { %3472 = vmatpush3.msra.mxu1 %v1021_v9  ;;  %p5307_p5 = scmp.ne.s32.totalorder %s5266_s2, 0 }
 0x128   : > { %3473 = vmatprep.subr.mxu1 %v4428_v8 }
 0x129   : > { %3474 = vmatpush3.msra.mxu1 %v1020_v10 }
 0x12a   : > { %3475 = vmatprep.subr.mxu1 %v4428_v8  ;;  %v978_v37 = vld [vmem:[%s5289_s13] sm:$0xff]  ;;  %s4440_s13 = smov 56  }
 0x12b   : > { %3476 = vmatpush3.msra.mxu1 %v1019_v11  ;;  %vm1103_vm5 = vcmp.ne.s32.totalorder %v978_v37, 0 }
 0x12c   : > { %3480 = vmatprep.subr.mxu1 %v4428_v8 }
 0x1af   : > { %v983_v2 = vpop.xlane.xlu0 %982 }
 0x1b0   : > { %v985_v3 = vmul.f32 0.03125, %v983_v2 }
 0x1b2   : > { %v986_v4 = vsub.f32 %v4839_v0, %v985_v3 }
 0x1b4   : > { %v987_v5 = vmul.f32 %v986_v4, %v986_v4 }
 0x1b6   : > { %v988_v6 = vsel %vm980_vm0, %v987_v5, 0.0 }
 0x1b7   : > { %989 = vadd.xlane.f32.xlu0 %v988_v6 }
 0x240   : > { %v990_v12 = vpop.xlane.xlu0 %989 }
 0x241   : > { %v992_v13 = vmul.f32 0.032258064, %v990_v12 }
 0x243   : > { %3850 = vrsqrt.f32 %v992_v13  ;;  %vm995_vm2 = vcmp.eq.f32.partialorder %v992_v13, inf  ;;  %v998_v16 = vand.u32 2147483648, %v992_v13  ;;  %vm997_vm3 = vcmp.eq.f32.partialorder %v992_v13, 0.0 }
 0x250   : > { %v3851_v14 = vpop.eup %3850 }
 0x251   : > { %v994_v15 = vmul.f32 %v3851_v14, %v992_v13 }
 0x253   : > { %v996_v17 = vsel %vm995_vm2, %v992_v13, %v994_v15 }
 0x254   : > { %v999_v18 = vsel %vm997_vm3, %v998_v16, %v996_v17 }
 0x255   : > { %v1001_v19 = vadd.f32 1e-06, %v999_v18 }
 0x257   : > { %3852 = vrcp.f32 %v1001_v19 }
 0x264   : > { %v3853_v20 = vpop.eup %3852 }
 0x265   : > { %v1003_v22 = vmul.f32 %v3853_v20, %v986_v4 }
 0x267   : > { %v1010_v24 = vmul.f32 %v3350_v21, %v1003_v22 }
 0x269   : > { %v1018_v25 = vadd.f32 %v3351_v23, %v1010_v24 }
 0x26b   : > { %3478 = vmatmul.mubr.msk.f32.vlgmr.msra.gmra.mxu1 %vm980_vm0, %v1018_v25 }
 0x26c   : > { %3482 = vmatprep.mubr.msk.f32.mxu1 %vm4429_vm1, %v4428_v8 }
 0x32b   : > { %v1099_v27 = vpop.f32.mrf.mxu1 }
 0x32c   : > { %v4870_v28 = vadd.f32 %v3352_v26, %v1099_v27 }
 0x32d   : > { %v3479_v29 = vpop.f32.mrf.mxu1 }
 0x32e   : > { %1271 = vrot.lane.b32.xlu0 %v4870_v28, %s5227_s7  ;;  %1105 = vrot.lane.b32.xlu1 %v4870_v28, %s5221_s30  ;;  %s5294_s7 = smov 112  }
 0x332   : > { %1273 = vrot.lane.b32.xlu1 %v4870_v28, %s5222_s4  ;;  %s5292_s4 = sld [smem:[#allocation47_spill]] }
 0x336   : > { %1440 = vrot.lane.b32.xlu1 %v4870_v28, %s5217_s3  ;;  %s5219_s3 = smov 16  }
 0x33a   : > { %1438 = vrot.lane.b32.xlu1 %v4870_v28, %s5225_s25  ;;  %s5299_s25 = smov 80  }
 0x33e   : > { %1607 = vrot.lane.b32.xlu1 %v4870_v28, %s5216_s24  ;;  %s5218_s24 = smov 24  }
 0x342   : > { %1605 = vrot.lane.b32.xlu1 %v4870_v28, %s5223_s11  ;;  %s5300_s11 = smov 72  }
 0x3a0   : > { %v1106_v30 = vpop.permute.xlu1 %1105  ;;  %v1272_v32 = vpop.permute.xlu0 %1271 }
 0x3a1   : > { %3481 = vmatpush3.xpose.msk.msra.mxu1 %vm1107_vm4, %v1106_v30 }
 0x3a2   : > { %3485 = vmatprep.subr.mxu1 %v4428_v8 }
 0x3a4   : > { %3483 = vmatmul.mubr.msk.f32.vlgmr.msra.gmra.mxu1 %vm1107_vm4, %v4870_v28  ;;  %v1274_v31 = vpop.permute.xlu1 %1273 }
 0x3a5   : > { %3491 = vmatpush3.xpose.msk.msra.mxu0 %vm1107_vm4, %v1274_v31  ;;  %3487 = vmatprep.mubr.msk.f32.mxu1 %vm4429_vm1, %v4428_v8 }
 0x3a6   : > { %3500 = vmatprep.subr.mxu0 %v4428_v8 }
 0x3a8   : > { %3493 = vmatmul.mubr.msk.f32.vlgmr.msra.gmra.mxu0 %vm1107_vm4, %v1272_v32  ;;  %v1441_v33 = vpop.permute.xlu1 %1440 }
 0x3a9   : > { %3501 = vmatpush3.xpose.msk.msra.mxu0 %vm1107_vm4, %v1441_v33  ;;  %3502 = vmatprep.mubr.msk.f32.mxu0 %vm4429_vm1, %v4428_v8 }
 0x3aa   : > { %3510 = vmatprep.subr.mxu0 %v4428_v8 }
 0x3ac   : > { %v1439_v34 = vpop.permute.xlu1 %1438 }
 0x3ad   : > { %3503 = vmatmul.mubr.msk.f32.vlgmr.msra.gmra.mxu0 %vm1107_vm4, %v1439_v34 }
 0x3ae   : > { %3512 = vmatprep.mubr.msk.f32.mxu0 %vm4429_vm1, %v4428_v8 }
 0x3b0   : > { %v1608_v35 = vpop.permute.xlu1 %1607 }
 0x3b1   : > { %3511 = vmatpush3.xpose.msk.msra.mxu0 %vm1107_vm4, %v1608_v35 }
 0x3b2   : > { %3520 = vmatprep.subr.mxu0 %v4428_v8 }
 0x3b4   : > { %v1606_v36 = vpop.permute.xlu1 %1605 }
 0x3b5   : > { %3513 = vmatmul.mubr.msk.f32.vlgmr.msra.gmra.mxu0 %vm1107_vm4, %v1606_v36 }
 0x3b6   : > { %3528 = vmatprep.mubr.msk.f32.mxu0 %vm4429_vm1, %v4428_v8 }
 0x464   : > { %v1178_v38 = vpop.f32.mrf.mxu1 }
 0x465   : > { %v1182_v39 = vmul.f32 0.35355338, %v1178_v38 }
 0x466   : > { %v3484_v40 = vpop.f32.mrf.mxu1 }
 0x467   : > { %v1183_v41 = vsel %vm1103_vm5, %v1182_v39, -1e+09 }
 0x468   : > { %v1345_v42 = vpop.f32.mrf.mxu0  ;;  %v1184_v43 = vsel %vm1107_vm4, %v1183_v41, -inf }
 0x469   : > { %v1349_v44 = vmul.f32 0.35355338, %v1345_v42  ;;  %1185 = vmax.xlane.f32.xlu1 %v1184_v43 }
 0x46a   : > { %v3494_v45 = vpop.f32.mrf.mxu0 }
 0x46b   : > { %v1350_v46 = vsel %vm1103_vm5, %v1349_v44, -1e+09 }
 0x46c   : > { %v1351_v47 = vsel %vm1107_vm4, %v1350_v46, -inf }
 0x46d   : > { %1352 = vmax.xlane.f32.xlu0 %v1351_v47  ;;  %v1512_v48 = vpop.f32.mrf.mxu0 }
 0x46e   : > { %v1516_v49 = vmul.f32 0.35355338, %v1512_v48 }
 0x46f   : > { %v3504_v50 = vpop.f32.mrf.mxu0 }
 0x470   : > { %v1517_v51 = vsel %vm1103_vm5, %v1516_v49, -1e+09  ;;  %v3366_v50 = vld [vmem:[#allocation7] ss:$0 sm:$0xff] }
 0x471   : > { %v1518_v52 = vsel %vm1107_vm4, %v1517_v51, -inf }
 0x472   : > { %1519 = vmax.xlane.f32.xlu1 %v1518_v52 }
 0x475   : > { %v1679_v53 = vpop.f32.mrf.mxu0 }
 0x476   : > { %v1683_v54 = vmul.f32 0.35355338, %v1679_v53 }
 0x477   : > { %v3514_v55 = vpop.f32.mrf.mxu0 }
 0x478   : > { %v1684_v56 = vsel %vm1103_vm5, %v1683_v54, -1e+09 }
 0x479   : > { %v1685_v57 = vsel %vm1107_vm4, %v1684_v56, -inf }
 0x47a   : > { %1686 = vmax.xlane.f32.xlu0 %v1685_v57 }
 0x483   : > { %1195 = vrot.lane.b32.xlu1 %v4870_v28, %s4437_s0  ;;  %s5295_s0 = smov 104  }
 0x4f2   : > { %v1186_v58 = vpop.xlane.xlu1 %1185 }
 0x4f3   : > { %v1187_v59 = vsub.f32 %v1183_v41, %v1186_v58 }
 0x4f5   : > { %v1188_v60 = vmul.f32 1.442695, %v1187_v59 }
 0x4f6   : > { %v1353_v61 = vpop.xlane.xlu0 %1352 }
 0x4f7   : > { %3854 = vpow2.f32 %v1188_v60  ;;  %v1354_v62 = vsub.f32 %v1350_v46, %v1353_v61 }
 0x4f9   : > { %v1355_v63 = vmul.f32 1.442695, %v1354_v62  ;;  %v1913_v62 = vld [vmem:[%s5292_s4 + $0x18] sm:$0xff] }
 0x4fb   : > { %3856 = vpow2.f32 %v1355_v63  ;;  %v1520_v1 = vpop.xlane.xlu1 %1519  ;;  %v1912_v63 = vld [vmem:[%s5292_s4 + $0x10] sm:$0xff] }
 0x4fc   : > { %v1521_v2 = vsub.f32 %v1517_v51, %v1520_v1 }
 0x4fe   : > { %v1522_v3 = vmul.f32 1.442695, %v1521_v2  ;;  %v1911_v2 = vld [vmem:[%s5292_s4 + $0x8] sm:$0xff] }
 0x4ff   : > { %v1196_v4 = vpop.permute.xlu1 %1195 }
 0x500   : > { %3858 = vpow2.f32 %v1522_v3  ;;  %3486 = vmatpush3.msra.mxu1 %v1196_v4  ;;  %v1910_v4 = vld [vmem:[%s5292_s4] sm:$0xff] }
 0x501   : > { %3495 = vmatprep.subr.mxu1 %v4428_v8 }
 0x503   : > { %v1687_v5 = vpop.xlane.xlu0 %1686 }
 0x504   : > { %v3855_v6 = vpop.eup %3854  ;;  %v1688_v7 = vsub.f32 %v1684_v56, %v1687_v5  ;;  %v977_v5 = vld [vmem:[%s4793_s18] sm:$0xff]  ;;  %s5293_s18 = smov 120  }
 0x505   : > { %v1190_v9 = vsel %vm1107_vm4, %v3855_v6, 0.0 }
 0x506   : > { %v1689_v10 = vmul.f32 1.442695, %v1688_v7  ;;  %1191 = vadd.xlane.f32.xlu1 %v1190_v9 }
 0x508   : > { %v3857_v11 = vpop.eup %3856  ;;  %3860 = vpow2.f32 %v1689_v10 }
 0x509   : > { %v1357_v12 = vsel %vm1107_vm4, %v3857_v11, 0.0 }
 0x50a   : > { %1358 = vadd.xlane.f32.xlu0 %v1357_v12 }
 0x50d   : > { %v3859_v13 = vpop.eup %3858 }
 0x50e   : > { %v1524_v14 = vsel %vm1107_vm4, %v3859_v13, 0.0 }
 0x50f   : > { %1525 = vadd.xlane.f32.xlu1 %v1524_v14 }
 0x515   : > { %v3861_v15 = vpop.eup %3860 }
 0x516   : > { %v1691_v16 = vsel %vm1107_vm4, %v3861_v15, 0.0 }
 0x517   : > { %1692 = vadd.xlane.f32.xlu0 %v1691_v16  ;;  %v3368_v16 = vld [vmem:[#allocation22] ss:$0 sm:$0xff] }
 0x520   : > { %1529 = vrot.lane.b32.xlu1 %v4870_v28, %s4438_s16  ;;  %s5291_s16 = sld [smem:[#allocation49_spill]] }
 0x524   : > { %1696 = vrot.lane.b32.xlu1 %v4870_v28, %s4439_s17  ;;  %s5290_s17 = sld [smem:[#allocation45_spill]] }
 0x526   : > { %v1997_v61 = vld [vmem:[%s5291_s16 + $0x18] sm:$0xff]  ;;  %v1995_v1 = vld [vmem:[%s5291_s16 + $0x8] sm:$0xff]  ;;  %v1994_v3 = vld [vmem:[%s5291_s16] sm:$0xff] }
 0x52a   : > { %v1792_v32 = vld [vmem:[%s5290_s17 + $0x18] sm:$0xff]  ;;  %v1791_v33 = vld [vmem:[%s5290_s17 + $0x10] sm:$0xff]  ;;  %v1790_v35 = vld [vmem:[%s5290_s17 + $0x8] sm:$0xff] }
 0x52b   : > { %3521 = vmatpush3.msra.mxu0 %v1792_v32  ;;  %v1789_v37 = vld [vmem:[%s5290_s17] sm:$0xff] }
 0x52c   : > { %3522 = vmatprep.subr.mxu0 %v4428_v8 }
 0x52d   : > { %1362 = vrot.lane.b32.xlu0 %v4870_v28, %s4440_s13  ;;  %3523 = vmatpush3.msra.mxu0 %v1791_v33 }
 0x52e   : > { %3524 = vmatprep.subr.mxu0 %v4428_v8 }
 0x52f   : > { %3525 = vmatpush3.msra.mxu0 %v1790_v35  ;;  %v2080_v35 = vlaneseq }
 0x530   : > { %3526 = vmatprep.subr.mxu0 %v4428_v8 }
 0x531   : > { %3527 = vmatpush3.msra.mxu0 %v1789_v37  ;;  %v2081_v37 = vshrl.u32 %v2080_v35, 7 }
 0x532   : > { %3542 = vmatprep.subr.mxu0 %v4428_v8 }
 0x58f   : > { %v1192_v17 = vpop.xlane.xlu1 %1191 }
 0x590   : > { %3862 = vrcp.f32 %v1192_v17 }
 0x593   : > { %v1359_v18 = vpop.xlane.xlu0 %1358 }
 0x594   : > { %3864 = vrcp.f32 %v1359_v18  ;;  %v3369_v18 = vld [vmem:[#allocation23] ss:$0 sm:$0xff] }
 0x598   : > { %v1526_v19 = vpop.xlane.xlu1 %1525 }
 0x599   : > { %3866 = vrcp.f32 %v1526_v19 }
 0x59c   : > { %v1530_v24 = vpop.permute.xlu1 %1529 }
 0x59d   : > { %v3863_v20 = vpop.eup %3862 }
 0x59e   : > { %v1194_v21 = vmul.f32 %v3863_v20, %v3855_v6 }
 0x5a0   : > { %v1693_v22 = vpop.xlane.xlu0 %1692  ;;  %3488 = vmatmul.mubr.msk.f32.vlgmr.msra.gmra.mxu1 %vm1107_vm4, %v1194_v21  ;;  %v1697_v29 = vpop.permute.xlu1 %1696  ;;  %v3372_v21 = vld [vmem:[#allocation10] ss:$0 sm:$0xff] }
 0x5a1   : > { %v3865_v23 = vpop.eup %3864  ;;  %3868 = vrcp.f32 %v1693_v22  ;;  %3497 = vmatprep.mubr.msk.f32.mxu1 %vm4429_vm1, %v4428_v8 }
 0x5a2   : > { %v1361_v26 = vmul.f32 %v3865_v23, %v3857_v11 }
 0x5a4   : > { %v1363_v25 = vpop.permute.xlu0 %1362 }
 0x5a5   : > { %3496 = vmatpush3.msra.mxu1 %v1363_v25 }
 0x5a6   : > { %v3867_v27 = vpop.eup %3866  ;;  %3498 = vmatmul.mubr.msk.f32.vlgmr.msra.gmra.mxu1 %vm1107_vm4, %v1361_v26  ;;  %3505 = vmatprep.subr.mxu1 %v4428_v8  ;;  %v3370_v26 = vld [vmem:[#allocation8] ss:$0 sm:$0xff] }
 0x5a7   : > { %3506 = vmatpush3.msra.mxu1 %v1530_v24  ;;  %3507 = vmatprep.mubr.msk.f32.mxu1 %vm4429_vm1, %v4428_v8  ;;  %v1528_v28 = vmul.f32 %v3867_v27, %v3859_v13 }
 0x5a8   : > { %3515 = vmatprep.subr.mxu1 %v4428_v8 }
 0x5aa   : > { %3508 = vmatmul.mubr.msk.f32.vlgmr.msra.gmra.mxu1 %vm1107_vm4, %v1528_v28 }
 0x5ab   : > { %3516 = vmatpush3.msra.mxu1 %v1697_v29  ;;  %3517 = vmatprep.mubr.msk.f32.mxu1 %vm4429_vm1, %v4428_v8 }
 0x5ac   : > { %3531 = vmatprep.subr.mxu1 %v4428_v8 }
 0x5ae   : > { %v3869_v30 = vpop.eup %3868 }
 0x5af   : > { %v1695_v31 = vmul.f32 %v3869_v30, %v3861_v15 }
 0x5b1   : > { %3518 = vmatmul.mubr.msk.f32.vlgmr.msra.gmra.mxu1 %vm1107_vm4, %v1695_v31 }
 0x5b2   : > { %3539 = vmatprep.mubr.msk.f32.mxu1 %vm4429_vm1, %v4428_v8  ;;  %3532 = vmatpush3.msra.mxu1 %v1913_v62 }
 0x5b3   : > { %3533 = vmatprep.subr.mxu1 %v4428_v8 }
 0x5b4   : > { %3534 = vmatpush3.msra.mxu1 %v1912_v63 }
 0x5b5   : > { %3535 = vmatprep.subr.mxu1 %v4428_v8 }
 0x5b6   : > { %3536 = vmatpush3.msra.mxu1 %v1911_v2 }
 0x5b7   : > { %3537 = vmatprep.subr.mxu1 %v4428_v8 }
 0x5b8   : > { %3538 = vmatpush3.msra.mxu1 %v1910_v4 }
 0x5b9   : > { %3553 = vmatprep.subr.mxu1 %v4428_v8 }
 0x660   : > { %v1267_v34 = vpop.f32.mrf.mxu1 }
 0x662   : > { %v3489_v36 = vpop.f32.mrf.mxu1 }
 0x666   : > { %v1434_v38 = vpop.f32.mrf.mxu1 }
 0x667   : > { %1773 = vrot.lane.b32.xlu0 %v1434_v38, %s5220_s15  ;;  %v2082_v38 = vsub.s32 0, %v2081_v37  ;;  %s5298_s15 = smov 96  }
 0x668   : > { %v3499_v39 = vpop.f32.mrf.mxu1 }
 0x669   : > { %v4444_v39 = vmov 0  }
 0x66a   : > { %v1601_v40 = vpop.f32.mrf.mxu1 }
 0x66b   : > { %1777 = vrot.lane.b32.xlu1 %v1601_v40, %s5219_s3 }
 0x66c   : > { %v3509_v41 = vpop.f32.mrf.mxu1 }
 0x671   : > { %v1768_v42 = vpop.f32.mrf.mxu1 }
 0x672   : > { %1781 = vrot.lane.b32.xlu0 %v1768_v42, %s5218_s24  ;;  %s5296_s24 = sld [smem:[#allocation42_spill]] }
 0x673   : > { %v3519_v43 = vpop.f32.mrf.mxu1 }
 0x678   : > { %s975_s30 = scalar_lea.vmem %s5296_s24, %s4833_s12  ;;  %s5297_s12 = smov 88  }
 0x679   : > { %v979_v36 = vld [vmem:[%s975_s30] sm:$0x1]  ;;  %s5304_s24 = sld [smem:[#allocation55_spill]] }
 0x67a   : > { %vm2078_vm10 = vcmp.ne.s32.totalorder %v979_v36, 0  ;;  %s5306_s30 = sld [smem:[#allocation58_spill]] }
 0x67b   : > { %v2079_v40 = vsel %vm2078_vm10, 1, %v4444_v39  ;;  %v2768_v39 = vld [vmem:[#allocation11 + $0x10] sm:$0xff] }
 0x67c   : > { %v2083_v41 = vrot.slane %v2079_v40, %v2082_v38  ;;  %v2769_v38 = vld [vmem:[#allocation11 + $0x18] sm:$0xff]  ;;  %v2767_v40 = vld [vmem:[#allocation11 + $0x8] sm:$0xff] }
 0x67e   : > { %vm2084_vm11 = vcmp.eq.s32.totalorder %v2083_v41, 1  ;;  %v2766_v41 = vld [vmem:[#allocation11] sm:$0xff] }
 0x6d9   : > { %v1774_v44 = vpop.permute.xlu0 %1773 }
 0x6da   : > { %v1784_v46 = vsel %vm1107_vm4, %v1267_v34, %v1774_v44 }
 0x6dd   : > { %v1778_v45 = vpop.permute.xlu1 %1777 }
 0x6de   : > { %v1786_v47 = vsel %vm1785_vm6, %v1784_v46, %v1778_v45 }
 0x6e4   : > { %v1782_v48 = vpop.permute.xlu0 %1781 }
 0x6e5   : > { %v1788_v49 = vsel %vm1787_vm7, %v1786_v47, %v1782_v48 }
 0x6e6   : > { %3529 = vmatmul.mubr.msk.f32.vlgmr.msra.gmra.mxu0 %vm980_vm0, %v1788_v49 }
 0x6e7   : > { %3550 = vmatprep.mubr.msk.f32.mxu0 %vm4429_vm1, %v4428_v8  ;;  %3543 = vmatpush3.msra.mxu0 %v1997_v61 }
 0x6e8   : > { %3544 = vmatprep.subr.mxu0 %v4428_v8 }
 0x7a6   : > { %v1869_v51 = vpop.f32.mrf.mxu0 }
 0x7a7   : > { %v1870_v52 = vadd.f32 %v3366_v50, %v1869_v51 }
 0x7a8   : > { %v3530_v53 = vpop.f32.mrf.mxu0 }
 0x7a9   : > { %v4968_v54 = vadd.f32 %v1870_v52, %v4839_v0  ;;  %v1996_v0 = vld [vmem:[%s5291_s16 + $0x10] sm:$0xff] }
 0x7aa   : > { %3545 = vmatpush3.msra.mxu0 %v1996_v0 }
 0x7ab   : > { %v1874_v55 = vsel %vm980_vm0, %v4968_v54, 0.0  ;;  %3546 = vmatprep.subr.mxu0 %v4428_v8 }
 0x7ac   : > { %1875 = vadd.xlane.f32.xlu1 %v1874_v55  ;;  %3547 = vmatpush3.msra.mxu0 %v1995_v1 }
 0x7ad   : > { %3548 = vmatprep.subr.mxu0 %v4428_v8 }
 0x7ae   : > { %3549 = vmatpush3.msra.mxu0 %v1994_v3 }
 0x7af   : > { %3551 = vmatmul.mubr.msk.f32.vlgmr.msra.gmra.mxu0 %vm980_vm0, %v977_v5  ;;  %3563 = vmatprep.subr.mxu0 %v4428_v8 }
 0x7b0   : > { %3565 = vmatprep.mubr.msk.f32.mxu0 %vm4429_vm1, %v4428_v8 }
 0x835   : > { %v1876_v56 = vpop.xlane.xlu1 %1875 }
 0x836   : > { %v1877_v57 = vmul.f32 0.03125, %v1876_v56 }
 0x838   : > { %v1878_v58 = vsub.f32 %v4968_v54, %v1877_v57 }
 0x83a   : > { %v1879_v59 = vmul.f32 %v1878_v58, %v1878_v58 }
 0x83c   : > { %v1880_v60 = vsel %vm980_vm0, %v1879_v59, 0.0 }
 0x83d   : > { %1881 = vadd.xlane.f32.xlu0 %v1880_v60 }
 0x86f   : > { %v2074_v22 = vpop.f32.mrf.mxu0 }
 0x870   : > { %v5013_v23 = vadd.f32 %v3372_v21, %v2074_v22 }
 0x871   : > { %v3552_v24 = vpop.f32.mrf.mxu0 }
 0x872   : > { %2252 = vrot.lane.b32.xlu0 %v5013_v23, %s5293_s18 }
 0x8c6   : > { %v1882_v6 = vpop.xlane.xlu0 %1881 }
 0x8c7   : > { %v1883_v7 = vmul.f32 0.032258064, %v1882_v6 }
 0x8c9   : > { %3870 = vrsqrt.f32 %v1883_v7  ;;  %vm1886_vm8 = vcmp.eq.f32.partialorder %v1883_v7, inf  ;;  %v1889_v11 = vand.u32 2147483648, %v1883_v7  ;;  %vm1888_vm9 = vcmp.eq.f32.partialorder %v1883_v7, 0.0 }
 0x8d6   : > { %v3871_v9 = vpop.eup %3870 }
 0x8d7   : > { %v1885_v10 = vmul.f32 %v3871_v9, %v1883_v7 }
 0x8d9   : > { %v1887_v12 = vsel %vm1886_vm8, %v1883_v7, %v1885_v10 }
 0x8da   : > { %v1890_v13 = vsel %vm1888_vm9, %v1889_v11, %v1887_v12 }
 0x8db   : > { %v1892_v14 = vadd.f32 1e-06, %v1890_v13 }
 0x8dd   : > { %3872 = vrcp.f32 %v1892_v14 }
 0x8e4   : > { %v2253_v25 = vpop.permute.xlu0 %2252 }
 0x8e5   : > { %3564 = vmatpush3.xpose.msk.msra.mxu0 %vm1107_vm4, %v2253_v25 }
 0x8e6   : > { %3573 = vmatprep.subr.mxu0 %v4428_v8 }
 0x8ea   : > { %v3873_v15 = vpop.eup %3872 }
 0x8eb   : > { %v1894_v17 = vmul.f32 %v3873_v15, %v1878_v58 }
 0x8ed   : > { %v1901_v19 = vmul.f32 %v3368_v16, %v1894_v17 }
 0x8ef   : > { %v1909_v20 = vadd.f32 %v3369_v18, %v1901_v19 }
 0x8f1   : > { %3540 = vmatmul.mubr.msk.f32.vlgmr.msra.gmra.mxu1 %vm980_vm0, %v1909_v20 }
 0x8f2   : > { %3555 = vmatprep.mubr.msk.f32.mxu1 %vm4429_vm1, %v4428_v8  ;;  %3554 = vmatpush3.xpose.msk.msra.mxu1 %vm1107_vm4, %v5013_v23 }
 0x8f3   : > { %3558 = vmatprep.subr.mxu1 %v4428_v8 }
 0x9b1   : > { %v1990_v27 = vpop.f32.mrf.mxu1 }
 0x9b2   : > { %v1991_v28 = vadd.f32 %v3370_v26, %v1990_v27 }
 0x9b3   : > { %v3541_v29 = vpop.f32.mrf.mxu1 }
 0x9b4   : > { %2417 = vrot.lane.b32.xlu0 %v1991_v28, %s5294_s7  ;;  %2250 = vrot.lane.b32.xlu1 %v1991_v28, %s5293_s18  ;;  %s5301_s18 = smov 8  }
 0x9b5   : > { %3556 = vmatmul.mubr.msk.f32.vlgmr.msra.gmra.mxu1 %vm1107_vm4, %v1991_v28 }
 0x9b6   : > { %3560 = vmatprep.mubr.msk.f32.mxu1 %vm4429_vm1, %v4428_v8 }
 0x9b8   : > { %2584 = vrot.lane.b32.xlu0 %v1991_v28, %s5295_s0  ;;  %2419 = vrot.lane.b32.xlu1 %v5013_v23, %s5294_s7  ;;  %s5302_s7 = smov 16  }
 0x9bc   : > { %2586 = vrot.lane.b32.xlu1 %v5013_v23, %s5295_s0  ;;  %s5303_s0 = smov 24  }
 0xa26   : > { %v2251_v30 = vpop.permute.xlu1 %2250  ;;  %v2418_v32 = vpop.permute.xlu0 %2417 }
 0xa27   : > { %3566 = vmatmul.mubr.msk.f32.vlgmr.msra.gmra.mxu0 %vm1107_vm4, %v2251_v30 }
 0xa28   : > { %3575 = vmatprep.mubr.msk.f32.mxu0 %vm4429_vm1, %v4428_v8 }
 0xa2a   : > { %v2420_v31 = vpop.permute.xlu1 %2419  ;;  %v2585_v34 = vpop.permute.xlu0 %2584 }
 0xa2b   : > { %3574 = vmatpush3.xpose.msk.msra.mxu0 %vm1107_vm4, %v2420_v31 }
 0xa2c   : > { %3583 = vmatprep.subr.mxu0 %v4428_v8 }
 0xa2e   : > { %3576 = vmatmul.mubr.msk.f32.vlgmr.msra.gmra.mxu0 %vm1107_vm4, %v2418_v32  ;;  %v2587_v33 = vpop.permute.xlu1 %2586 }
 0xa2f   : > { %3584 = vmatpush3.xpose.msk.msra.mxu0 %vm1107_vm4, %v2587_v33  ;;  %3585 = vmatprep.mubr.msk.f32.mxu0 %vm4429_vm1, %v4428_v8 }
 0xa30   : > { %3593 = vmatprep.subr.mxu0 %v4428_v8 }
 0xa32   : > { %3586 = vmatmul.mubr.msk.f32.vlgmr.msra.gmra.mxu0 %vm1107_vm4, %v2585_v34 }
 0xa33   : > { %3601 = vmatprep.mubr.msk.f32.mxu0 %vm4429_vm1, %v4428_v8  ;;  %3594 = vmatpush3.msra.mxu0 %v2769_v38 }
 0xa34   : > { %3595 = vmatprep.subr.mxu0 %v4428_v8 }
 0xa35   : > { %3596 = vmatpush3.msra.mxu0 %v2768_v39 }
 0xa36   : > { %3597 = vmatprep.subr.mxu0 %v4428_v8 }
 0xa37   : > { %3598 = vmatpush3.msra.mxu0 %v2767_v40 }
 0xa38   : > { %3599 = vmatprep.subr.mxu0 %v4428_v8 }
 0xa39   : > { %3600 = vmatpush3.msra.mxu0 %v2766_v41 }
 0xa3a   : > { %3615 = vmatprep.subr.mxu0 %v4428_v8 }
 0xa75   : > { %v2157_v42 = vpop.f32.mrf.mxu1 }
 0xa76   : > { %v2161_v43 = vmul.f32 0.35355338, %v2157_v42 }
 0xa77   : > { %v3557_v44 = vpop.f32.mrf.mxu1 }
 0xa78   : > { %v2162_v45 = vsel %vm2084_vm11, %v2161_v43, -1e+09 }
 0xa79   : > { %v2163_v46 = vsel %vm1107_vm4, %v2162_v45, -inf }
 0xa7a   : > { %2164 = vmax.xlane.f32.xlu1 %v2163_v46 }
 0xae7   : > { %v2324_v47 = vpop.f32.mrf.mxu0 }
 0xae8   : > { %v2328_v48 = vmul.f32 0.35355338, %v2324_v47 }
 0xae9   : > { %v3567_v49 = vpop.f32.mrf.mxu0 }
 0xaea   : > { %v2329_v50 = vsel %vm2084_vm11, %v2328_v48, -1e+09 }
 0xaeb   : > { %v2330_v51 = vsel %vm1107_vm4, %v2329_v50, -inf }
 0xaec   : > { %2331 = vmax.xlane.f32.xlu0 %v2330_v51 }
 0xaee   : > { %v2491_v52 = vpop.f32.mrf.mxu0 }
 0xaef   : > { %v2495_v53 = vmul.f32 0.35355338, %v2491_v52 }
 0xaf0   : > { %v3577_v55 = vpop.f32.mrf.mxu0 }
 0xaf1   : > { %v2496_v56 = vsel %vm2084_vm11, %v2495_v53, -1e+09  ;;  %v3386_v55 = vld [vmem:[#allocation13] ss:$0 sm:$0xff] }
 0xaf2   : > { %v2658_v57 = vpop.f32.mrf.mxu0  ;;  %v2497_v58 = vsel %vm1107_vm4, %v2496_v56, -inf }
 0xaf3   : > { %v2662_v59 = vmul.f32 0.35355338, %v2658_v57  ;;  %2498 = vmax.xlane.f32.xlu0 %v2497_v58 }
 0xaf4   : > { %v3587_v60 = vpop.f32.mrf.mxu0 }
 0xaf5   : > { %v2663_v61 = vsel %vm2084_vm11, %v2662_v59, -1e+09 }
 0xaf6   : > { %v2664_v0 = vsel %vm1107_vm4, %v2663_v61, -inf }
 0xaf7   : > { %2665 = vmax.xlane.f32.xlu1 %v2664_v0 }
 0xb03   : > { %v2165_v62 = vpop.xlane.xlu1 %2164 }
 0xb04   : > { %v2166_v63 = vsub.f32 %v2162_v45, %v2165_v62 }
 0xb06   : > { %v2167_v1 = vmul.f32 1.442695, %v2166_v63 }
 0xb08   : > { %3874 = vpow2.f32 %v2167_v1  ;;  %2341 = vrot.lane.b32.xlu1 %v5013_v23, %s5297_s12 }
 0xb15   : > { %v3875_v2 = vpop.eup %3874 }
 0xb16   : > { %v2169_v3 = vsel %vm1107_vm4, %v3875_v2, 0.0 }
 0xb17   : > { %2170 = vadd.xlane.f32.xlu0 %v2169_v3  ;;  %v2889_v3 = vld [vmem:[#allocation14 + $0x10] sm:$0xff] }
 0xb2d   : > { %2174 = vrot.lane.b32.xlu0 %v5013_v23, %s5298_s15  ;;  %s3064_s15 = scalar_lea.sflag [#allocation4], %s4787_s14 }
 0xb75   : > { %v2332_v4 = vpop.xlane.xlu0 %2331 }
 0xb76   : > { %v2333_v5 = vsub.f32 %v2329_v50, %v2332_v4  ;;  %v2888_v4 = vld [vmem:[#allocation14 + $0x8] sm:$0xff] }
 0xb78   : > { %v2334_v6 = vmul.f32 1.442695, %v2333_v5  ;;  %v2979_v5 = vld [vmem:[%s5304_s24 + $0x38] sm:$0xff] }
 0xb7a   : > { %3876 = vpow2.f32 %v2334_v6  ;;  %v2978_v6 = vld [vmem:[%s5304_s24 + $0x30] sm:$0xff] }
 0xb7c   : > { %v2499_v7 = vpop.xlane.xlu0 %2498 }
 0xb7d   : > { %v2500_v9 = vsub.f32 %v2496_v56, %v2499_v7  ;;  %v2977_v7 = vld [vmem:[%s5304_s24 + $0x28] sm:$0xff] }
 0xb7f   : > { %v2501_v10 = vmul.f32 1.442695, %v2500_v9  ;;  %v2976_v9 = vld [vmem:[%s5304_s24 + $0x20] sm:$0xff] }
 0xb80   : > { %v2666_v11 = vpop.xlane.xlu1 %2665 }
 0xb81   : > { %3878 = vpow2.f32 %v2501_v10  ;;  %v2667_v12 = vsub.f32 %v2663_v61, %v2666_v11  ;;  %v2975_v10 = vld [vmem:[%s5304_s24 + $0x18] sm:$0xff] }
 0xb83   : > { %v2668_v13 = vmul.f32 1.442695, %v2667_v12 }
 0xb84   : > { %v2342_v25 = vpop.permute.xlu1 %2341 }
 0xb85   : > { %3880 = vpow2.f32 %v2668_v13 }
 0xb87   : > { %v3877_v14 = vpop.eup %3876 }
 0xb88   : > { %v2336_v15 = vsel %vm1107_vm4, %v3877_v14, 0.0 }
 0xb89   : > { %2337 = vadd.xlane.f32.xlu1 %v2336_v15 }
 0xb8e   : > { %v3879_v16 = vpop.eup %3878 }
 0xb8f   : > { %v2503_v17 = vsel %vm1107_vm4, %v3879_v16, 0.0 }
 0xb90   : > { %2504 = vadd.xlane.f32.xlu0 %v2503_v17 }
 0xb92   : > { %v3881_v18 = vpop.eup %3880 }
 0xb93   : > { %v2670_v19 = vsel %vm1107_vm4, %v3881_v18, 0.0 }
 0xb94   : > { %2671 = vadd.xlane.f32.xlu1 %v2670_v19 }
 0xba0   : > { %v2171_v20 = vpop.xlane.xlu0 %2170 }
 0xba1   : > { %3882 = vrcp.f32 %v2171_v20  ;;  %v3388_v20 = vld [vmem:[#allocation25] ss:$0 sm:$0xff] }
 0xba4   : > { %v2175_v21 = vpop.permute.xlu0 %2174 }
 0xba5   : > { %3559 = vmatpush3.msra.mxu1 %v2175_v21  ;;  %2508 = vrot.lane.b32.xlu1 %v5013_v23, %s5299_s25 }
 0xba6   : > { %2675 = vrot.lane.b32.xlu0 %v5013_v23, %s5300_s11  ;;  %3568 = vmatprep.subr.mxu1 %v4428_v8  ;;  %s3395_s11 = sshll.u32 %s4592_s29, 7  ;;  %s4445_s29 = smov [#allocation28]  }
 0xba7   : > { %s3075_s12 = scalar_lea.hbm %s5306_s30, %s3395_s11 }
 0xbae   : > { %v3883_v22 = vpop.eup %3882 }
 0xbaf   : > { %v2173_v24 = vmul.f32 %v3883_v22, %v3875_v2  ;;  %v2890_v2 = vld [vmem:[#allocation14 + $0x18] sm:$0xff]  ;;  %v3389_v22 = vld [vmem:[#allocation26] ss:$0 sm:$0xff] }
 0xbb1   : > { %3561 = vmatmul.mubr.msk.f32.vlgmr.msra.gmra.mxu1 %vm1107_vm4, %v2173_v24 }
 0xbb2   : > { %3569 = vmatpush3.msra.mxu1 %v2342_v25  ;;  %3570 = vmatprep.mubr.msk.f32.mxu1 %vm4429_vm1, %v4428_v8 }
 0xbb3   : > { %3578 = vmatprep.subr.mxu1 %v4428_v8 }
 0xc12   : > { %v2338_v26 = vpop.xlane.xlu1 %2337 }
 0xc13   : > { %3884 = vrcp.f32 %v2338_v26  ;;  %v2974_v26 = vld [vmem:[%s5304_s24 + $0x10] sm:$0xff] }
 0xc19   : > { %v2505_v27 = vpop.xlane.xlu0 %2504 }
 0xc1a   : > { %3886 = vrcp.f32 %v2505_v27  ;;  %v2973_v27 = vld [vmem:[%s5304_s24 + $0x8] sm:$0xff] }
 0xc1d   : > { %v2672_v28 = vpop.xlane.xlu1 %2671  ;;  %v2676_v33 = vpop.permute.xlu0 %2675 }
 0xc1e   : > { %3888 = vrcp.f32 %v2672_v28  ;;  %v2972_v28 = vld [vmem:[%s5304_s24] sm:$0xff] }
 0xc20   : > { %v3885_v23 = vpop.eup %3884 }
 0xc21   : > { %v2509_v29 = vpop.permute.xlu1 %2508  ;;  %v2340_v30 = vmul.f32 %v3885_v23, %v3877_v14  ;;  %v3390_v23 = vld [vmem:[#allocation16] ss:$0 sm:$0xff] }
 0xc23   : > { %3571 = vmatmul.mubr.msk.f32.vlgmr.msra.gmra.mxu1 %vm1107_vm4, %v2340_v30 }
 0xc24   : > { %3579 = vmatpush3.msra.mxu1 %v2509_v29  ;;  %3580 = vmatprep.mubr.msk.f32.mxu1 %vm4429_vm1, %v4428_v8 }
 0xc25   : > { %3588 = vmatprep.subr.mxu1 %v4428_v8 }
 0xc27   : > { %v3887_v31 = vpop.eup %3886 }
 0xc28   : > { %v2507_v32 = vmul.f32 %v3887_v31, %v3879_v16 }
 0xc2a   : > { %3581 = vmatmul.mubr.msk.f32.vlgmr.msra.gmra.mxu1 %vm1107_vm4, %v2507_v32 }
 0xc2b   : > { %v3889_v34 = vpop.eup %3888  ;;  %3589 = vmatpush3.msra.mxu1 %v2676_v33  ;;  %3590 = vmatprep.mubr.msk.f32.mxu1 %vm4429_vm1, %v4428_v8  ;;  %v3392_v33 = vld [vmem:[#allocation17] ss:$0 sm:$0xff] }
 0xc2c   : > { %v2674_v35 = vmul.f32 %v3889_v34, %v3881_v18  ;;  %3604 = vmatprep.subr.mxu1 %v4428_v8 }
 0xc2e   : > { %3591 = vmatmul.mubr.msk.f32.vlgmr.msra.gmra.mxu1 %vm1107_vm4, %v2674_v35 }
 0xc2f   : > { %3612 = vmatprep.mubr.msk.f32.mxu1 %vm4429_vm1, %v4428_v8  ;;  %3605 = vmatpush3.msra.mxu1 %v2890_v2 }
 0xc30   : > { %3606 = vmatprep.subr.mxu1 %v4428_v8 }
 0xc31   : > { %3607 = vmatpush3.msra.mxu1 %v2889_v3 }
 0xc32   : > { %3608 = vmatprep.subr.mxu1 %v4428_v8 }
 0xc33   : > { %3609 = vmatpush3.msra.mxu1 %v2888_v4 }
 0xc34   : > { %3610 = vmatprep.subr.mxu1 %v4428_v8 }
 0xc71   : > { %v2246_v36 = vpop.f32.mrf.mxu1 }
 0xc73   : > { %v3562_v37 = vpop.f32.mrf.mxu1 }
 0xce3   : > { %v2413_v42 = vpop.f32.mrf.mxu1 }
 0xce4   : > { %2752 = vrot.lane.b32.xlu1 %v2413_v42, %s5301_s18  ;;  %s5305_s18 = sshll.u32 %s4787_s14, 3 }
 0xce5   : > { %v3572_v43 = vpop.f32.mrf.mxu1 }
 0xcea   : > { %v2580_v44 = vpop.f32.mrf.mxu1 }
 0xceb   : > { %2756 = vrot.lane.b32.xlu0 %v2580_v44, %s5302_s7  ;;  %s968_s7 = scalar_lea.vmem [#allocation28], %s5305_s18  ;;  %s4316_s18 = sshll.u32 %s4445_s29, 4  ;;  %s4317_s18 = int_to_ptr.vmem [resolvable:$false] %s4316_s18 }
 0xcec   : > { %v3582_v45 = vpop.f32.mrf.mxu1  ;;  %s4318_s1 = scalar_lea.vmem %s4317_s18, 256 }
 0xcee   : > { %v2747_v46 = vpop.f32.mrf.mxu1 }
 0xcef   : > { %2760 = vrot.lane.b32.xlu1 %v2747_v46, %s5303_s0  ;;  %s3077_s0 = sshll.u32 %s968_s7, 4  ;;  %s3078_s0 = int_to_ptr.vmem [resolvable:$true] %s3077_s0 }
 0xcf0   : > { %v3592_v47 = vpop.f32.mrf.mxu1  ;;  %s4312_s25 = scalar_lea.vmem %s3078_s0, 128  ;;  %p4319_p10 = scmp.lt.s32.totalorder %s3078_s0, %s4317_s18 }
 0xcf1   : > { %p4313_p7 = scmp.ne.s32.totalorder %s3078_s0, %s4312_s25  ;;  %p4320_p12 = scmp.lt.s32.totalorder %s4318_s1, %s4312_s25 }
 0xcf3   : > { %p4314_p8 = pnand %p4313_p7, %p5307_p5  ;;  %p4321_p13 = por %p4320_p12, %p4319_p10 }
 0xcf5   : > { %p4315_p9 = pneg %p4314_p8 }
 0xcf7   : > { %p4322_p3 = pnand %p4321_p13, %p4315_p9 }
 0xd56   : > { %v2753_v48 = vpop.permute.xlu1 %2752 }
 0xd57   : > { %v2763_v50 = vsel %vm1107_vm4, %v2246_v36, %v2753_v48 }
 0xd5d   : > { %v2757_v49 = vpop.permute.xlu0 %2756 }
 0xd5e   : > { %v2764_v51 = vsel %vm1785_vm6, %v2763_v50, %v2757_v49 }
 0xd61   : > { %v2761_v52 = vpop.permute.xlu1 %2760 }
 0xd62   : > { %v2765_v53 = vsel %vm1787_vm7, %v2764_v51, %v2761_v52 }
 0xd63   : > { %3602 = vmatmul.mubr.msk.f32.vlgmr.msra.gmra.mxu0 %vm980_vm0, %v2765_v53 }
 0xd64   : > { %3631 = vmatprep.mubr.msk.f32.mxu0 %vm4429_vm1, %v4428_v8  ;;  %3616 = vmatpush3.msra.mxu0 %v2979_v5 }
 0xd65   : > { %3617 = vmatprep.subr.mxu0 %v4428_v8 }
 0xd66   : > { %3618 = vmatpush3.msra.mxu0 %v2978_v6 }
 0xd67   : > { %3619 = vmatprep.subr.mxu0 %v4428_v8 }
 0xd68   : > { %3620 = vmatpush3.msra.mxu0 %v2977_v7 }
 0xd69   : > { %3621 = vmatprep.subr.mxu0 %v4428_v8 }
 0xd6a   : > { %3622 = vmatpush3.msra.mxu0 %v2976_v9 }
 0xd6b   : > { %3623 = vmatprep.subr.mxu0 %v4428_v8 }
 0xd6c   : > { %3624 = vmatpush3.msra.mxu0 %v2975_v10 }
 0xd6d   : > { %3625 = vmatprep.subr.mxu0 %v4428_v8 }
 0xd6e   : > { %3626 = vmatpush3.msra.mxu0 %v2974_v26 }
 0xd6f   : > { %3627 = vmatprep.subr.mxu0 %v4428_v8 }
 0xd70   : > { %3628 = vmatpush3.msra.mxu0 %v2973_v27 }
 0xd71   : > { %3629 = vmatprep.subr.mxu0 %v4428_v8 }
 0xd72   : > { %3630 = vmatpush3.msra.mxu0 %v2972_v28 }
 0xe23   : > { %v2846_v56 = vpop.f32.mrf.mxu0 }
 0xe24   : > { %v2847_v57 = vadd.f32 %v3386_v55, %v2846_v56 }
 0xe25   : > { %v3603_v58 = vpop.f32.mrf.mxu0 }
 0xe26   : > { %v5099_v59 = vadd.f32 %v2847_v57, %v4968_v54  ;;  %v2887_v54 = vld [vmem:[#allocation14] sm:$0xff] }
 0xe27   : > { %3611 = vmatpush3.msra.mxu1 %v2887_v54 }
 0xe28   : > { %v2851_v60 = vsel %vm980_vm0, %v5099_v59, 0.0 }
 0xe29   : > { %2852 = vadd.xlane.f32.xlu0 %v2851_v60 }
 0xeb2   : > { %v2853_v61 = vpop.xlane.xlu0 %2852 }
 0xeb3   : > { %v2854_v0 = vmul.f32 0.03125, %v2853_v61 }
 0xeb5   : > { %v2855_v62 = vsub.f32 %v5099_v59, %v2854_v0 }
 0xeb7   : > { %v2856_v63 = vmul.f32 %v2855_v62, %v2855_v62 }
 0xeb9   : > { %v2857_v1 = vsel %vm980_vm0, %v2856_v63, 0.0 }
 0xeba   : > { %2858 = vadd.xlane.f32.xlu1 %v2857_v1 }
 0xf43   : > { %v2859_v11 = vpop.xlane.xlu1 %2858 }
 0xf44   : > { %v2860_v12 = vmul.f32 0.032258064, %v2859_v11 }
 0xf46   : > { %3890 = vrsqrt.f32 %v2860_v12  ;;  %vm2863_vm12 = vcmp.eq.f32.partialorder %v2860_v12, inf  ;;  %v2866_v15 = vand.u32 2147483648, %v2860_v12  ;;  %vm2865_vm13 = vcmp.eq.f32.partialorder %v2860_v12, 0.0 }
 0xf53   : > { %v3891_v13 = vpop.eup %3890 }
 0xf54   : > { %v2862_v14 = vmul.f32 %v3891_v13, %v2860_v12 }
 0xf56   : > { %v2864_v16 = vsel %vm2863_vm12, %v2860_v12, %v2862_v14 }
 0xf57   : > { %v2867_v17 = vsel %vm2865_vm13, %v2866_v15, %v2864_v16 }
 0xf58   : > { %v2869_v18 = vadd.f32 1e-06, %v2867_v17 }
 0xf5a   : > { %3892 = vrcp.f32 %v2869_v18 }
 0xf67   : > { %v3893_v19 = vpop.eup %3892 }
 0xf68   : > { %v2871_v21 = vmul.f32 %v3893_v19, %v2855_v62 }
 0xf6a   : > { %v2878_v24 = vmul.f32 %v3388_v20, %v2871_v21 }
 0xf6c   : > { %v2886_v25 = vadd.f32 %v3389_v22, %v2878_v24 }
 0xf6e   : > { %3613 = vmatmul.mubr.msk.f32.vlgmr.msra.gmra.mxu1 %vm980_vm0, %v2886_v25 }
0x102e   : > { %v2967_v29 = vpop.f32.mrf.mxu1 }
0x102f   : > { %v2968_v30 = vadd.f32 %v3390_v23, %v2967_v29 }
0x1030   : > { %v3614_v31 = vpop.f32.mrf.mxu1 }
0x1031   : > { %v2971_v32 = vmax.f32 %v2968_v30, 0.0 }
0x1033   : > { %3632 = vmatmul.mubr.msk.f32.vlgmr.msra.gmra.mxu0 %vm2987_vm14, %v2971_v32 }
0x10f3   : > { %v3057_v34 = vpop.f32.mrf.mxu0 }
0x10f4   : > { %v3058_v35 = vadd.f32 %v3392_v33, %v3057_v34 }
0x10f5   : > { %v3633_v36 = vpop.f32.mrf.mxu0 }
0x10f6   : > { %v3061_v8 = vadd.f32 %v3058_v35, %v5099_v59 }
0x10f8   : > { %3062 = vst.msk [vmem:[%s968_s7] sm:$0xff] %vm980_vm0, %v3061_v8 }
0x10f9   : > { %4325 = shalt.err (!%p4322_p3)
}
0x10fa   : > { %s4326_s13 = scalar_lea.hbm %s3075_s12, 128  ;;  %s4330_s7 = scalar_lea.hbm %s5306_s30, 256 }
0x10fb   : > { %p4327_p4 = scmp.ne.s32.totalorder %s3075_s12, %s4326_s13  ;;  %p4331_p6 = scmp.lt.s32.totalorder %s3075_s12, %s5306_s30 }
0x10fc   : > { %p4332_p0 = scmp.lt.s32.totalorder %s4330_s7, %s4326_s13 }
0x10fd   : > { %p4328_p2 = pnand %p4327_p4, %p5307_p5 }
0x10fe   : > { %p4333_p1 = por %p4332_p0, %p4331_p6 }
0x10ff   : > { %p4329_p11 = pneg %p4328_p2 }
0x1101   : > { %p4334_p7 = pnand %p4333_p1, %p4329_p11 }
0x1103   : > { %4337 = shalt.err (!%p4334_p7)
}
0x1104   : > { %3696 = dma.vmem_to_hbm [thread:$0]  (%p5307_p5), %s3078_s0, 128, %s3075_s12, %s3064_s15  }
0x1105 PF: > { %s3089_s1 = sand.u32 1, %s4396_s5   ;;  %p5308_p8 = scmp.ne.s32.totalorder %s5267_s9, 0 }
0x1106   : > { %p5309_p9 = scmp.ge.s32.totalorder %s4408_s28, 2  ;;  %s3090_s25 = scalar_lea.sflag [#allocation4], %s3089_s1 }
0x1108   : > { %p3749_p10 = pnand %p5309_p9, %p5308_p8 }
0x110a   : > { %p3750_p12 = pneg %p3749_p10 }
0x110c   : > { %4391 = dma.done.wait (%p3750_p12), %s3090_s25, 128  }
0x110d   : > { %4393 = vsyncadd (%p3750_p12), %s3090_s25, 4294967168  ;;  %p45_p13 = scmp.ge.s32.totalorder %s4730_s8, 4   ;;  %s5310_s5 = smov %s4400_s26 }
0x110e   : > { %s5311_s26 = smov %s4404_s27  ;;  %s5312_s27 = smov %s4742_s10 }
0x110f   : > { %s5313_s28 = smov %s4730_s8  ;;  %47 = sbr.rel (!%p45_p13) target bundleno = 34 (0x22), region = 227 }
0x1114   :  { %3095 = vsyncpa [#allocation3], 1 }
0x1115   :  { %3097 = vsyncpa [#allocation3 + $0x1], 1 }
0x1116   :  { %3098 = vsyncpa [#allocation6], 1 }
0x1117   :  { %3099 = vsyncpa [#allocation9], 1 }
0x1118   :  { %3100 = vsyncpa [#allocation12], 1 }
0x1119   :  { %3101 = vsyncpa [#allocation15], 1 }
0x111a   :  { %3102 = vsyncpa [#allocation18], 1 }
0x111b   :  { %3103 = vsyncpa [#allocation21], 1 }
0x111c   :  { %3104 = vsyncpa [#allocation24], 1 }
0x111d   :  { %3105 = vsyncpa [#allocation27], 1 }
0x111e   :  { %3106 = vsyncpa [#allocation4], 1 }
0x111f   :  { %3108 = vsyncpa [#allocation4 + $0x1], 1 }

</bundles_post_ra>
